<compile_context>
chip_gen: v6e
topology: v6e:2x2x1
jax: 0.10.0
libtpu: 0.0.40
codegen_flags: <defaults>
</compile_context>

<pallas_src>
import functools

import jax
import jax.numpy as jnp
from jax.experimental import pallas as pl
from jax.experimental.pallas import tpu as pltpu


def _matvec_kernel(x_ref, w_ref, b_ref, o_ref):
    # One batch tile per grid step: o = x @ w_eff + b_eff  (MXU matvec, f32 acc).
    y = jnp.dot(x_ref[...], w_ref[...], preferred_element_type=jnp.float32)  # (tm, C)
    o_ref[...] = (y + b_ref[...]).astype(o_ref.dtype)                        # + (1, C)


def _round_up(n, m):
    return ((n + m - 1) // m) * m


def _pick_tile(n, tm_max):
    """Batch tile: >=2 grid steps when possible (v7x dual TensorCore), capped
    at tm_max (per-step-overhead amortization vs. VMEM), multiple of 16 so the
    same tile is valid for both f32 (8-sublane) and bf16 (16-sublane) layouts."""
    if n <= 16:
        return 16
    half = _round_up((n + 1) // 2, 16)
    return max(16, min(tm_max, half))


@functools.partial(jax.jit, static_argnames=("tm_max", "stream_bf16"))
def classifier_forward(x, w1, b1, w2, b2, *, tm_max=2048, stream_bf16=False):
    """Forward of ClassifierModel: Linear(D->64) -> Linear(64->C), no activation.

    The two linears are folded into one matvec in the wrapper (exact only
    because there is no activation between them); the Pallas kernel streams x
    through VMEM in large batch tiles with a resident folded weight.
    """
    N, D = x.shape
    C = w2.shape[1]

    # Fold the two linear layers (tiny [D,64]@[64,C] done once by XLA).
    w_eff = jnp.dot(w1, w2, preferred_element_type=jnp.float32)        # (D, C)
    b_eff = jnp.dot(b1, w2, preferred_element_type=jnp.float32) + b2   # (1, C)

    if stream_bf16:
        # Halve HBM traffic on the bandwidth-bound x stream; f32 MXU accumulate.
        x = x.astype(jnp.bfloat16)
        w_eff = w_eff.astype(jnp.bfloat16)

    tm = _pick_tile(N, tm_max)
    grid = (pl.cdiv(N, tm),)
    itemsize = jnp.dtype(x.dtype).itemsize

    out = pl.pallas_call(
        _matvec_kernel,
        out_shape=jax.ShapeDtypeStruct((N, C), jnp.float32),
        grid_spec=pltpu.PrefetchScalarGridSpec(
            num_scalar_prefetch=0,
            grid=grid,
            in_specs=[
                pl.BlockSpec((tm, D), lambda i: (i, 0)),   # x: tiled over batch (ragged last block OK)
                pl.BlockSpec((D, C), lambda i: (0, 0)),    # folded weight: resident (constant index_map)
                pl.BlockSpec((1, C), lambda i: (0, 0)),    # folded bias: resident
            ],
            out_specs=pl.BlockSpec((tm, C), lambda i: (i, 0)),
        ),
        compiler_params=pltpu.CompilerParams(
            dimension_semantics=("parallel",),
        ),
        cost_estimate=pl.CostEstimate(
            flops=2 * N * D * C,
            transcendentals=0,
            bytes_accessed=itemsize * (N * D + D * C) + 4 * (C + N * C),
        ),
    )(x, w_eff, b_eff)
    return out


def init_params(key, embedding_dim=384, hidden=64, num_classes=1):
    # Deterministic init mimicking torch.nn.Linear default (uniform +-1/sqrt(fan_in)).
    k1, k2, k3, k4 = jax.random.split(key, 4)
    bound1 = 1.0 / jnp.sqrt(jnp.float32(embedding_dim))
    bound2 = 1.0 / jnp.sqrt(jnp.float32(hidden))
    w1 = jax.random.uniform(k1, (embedding_dim, hidden), jnp.float32, -bound1, bound1)
    b1 = jax.random.uniform(k2, (1, hidden), jnp.float32, -bound1, bound1)
    w2 = jax.random.uniform(k3, (hidden, num_classes), jnp.float32, -bound2, bound2)
    b2 = jax.random.uniform(k4, (1, num_classes), jnp.float32, -bound2, bound2)
    return w1, b1, w2, b2


def reference_forward(x, w1, b1, w2, b2):
    # Pure-JAX reference of the ORIGINAL two-layer forward (un-folded).
    return (x @ w1 + b1) @ w2 + b2


if __name__ == "__main__":
    EMBEDDING_DIM = 384   # matches ClassifierModel(..., embedding_dim=384)
    HIDDEN = 64
    NUM_CLASSES = 1
    BATCH = 1000          # not a multiple of the tile -> exercises the ragged last block

    key = jax.random.PRNGKey(0)
    k_x, k_p = jax.random.split(key)

    # input['input_embeddings']: (N, 384) float32
    x = jax.random.normal(k_x, (BATCH, EMBEDDING_DIM), jnp.float32)
    w1, b1, w2, b2 = init_params(k_p, EMBEDDING_DIM, HIDDEN, NUM_CLASSES)

    ref = reference_forward(x, w1, b1, w2, b2)

    # Default f32 path: preserves module numerics.
    out = jax.block_until_ready(classifier_forward(x, w1, b1, w2, b2))
    assert out.shape == (BATCH, NUM_CLASSES), out.shape
    assert jnp.allclose(out, ref, atol=2e-4, rtol=2e-4), "f32 path mismatch vs reference"

    # Optional bf16-streaming path (2x HBM traffic reduction, relaxed tolerance).
    out_bf16 = jax.block_until_ready(
        classifier_forward(x, w1, b1, w2, b2, stream_bf16=True))
    assert out_bf16.shape == (BATCH, NUM_CLASSES), out_bf16.shape
    assert jnp.allclose(out_bf16, ref, atol=5e-2, rtol=5e-2), "bf16 path mismatch vs reference"

    print("KERNEL_OK")
</pallas_src>

<mosaic_0001>
module attributes {stable_mosaic.version = 11 : i64} {
  func.func @_matvec_kernel(%arg0: i32, %arg1: memref<512x384xf32, #tpu.memory_space<vmem>>, %arg2: memref<384x1xf32, #tpu.memory_space<vmem>>, %arg3: memref<1x1xf32, #tpu.memory_space<vmem>>, %arg4: memref<512x1xf32, #tpu.memory_space<vmem>>) attributes {dimension_semantics = [#tpu.dimension_semantics<parallel>], iteration_bounds = array<i64: 2>, scalar_prefetch = 0 : i64, scratch_operands = 0 : i64, tpu.core_type = #tpu.core_type<tc>, window_params = [{transform_indices = @transform_0, window_bounds = array<i64: 512, 384>}, {pipeline_mode = #tpu.pipeline_mode<synchronous>, transform_indices = @transform_1, window_bounds = array<i64: 384, 1>}, {pipeline_mode = #tpu.pipeline_mode<synchronous>, transform_indices = @transform_2, window_bounds = array<i64: 1, 1>}, {transform_indices = @transform_3, window_bounds = array<i64: 512, 1>}]} {
    %c0 = arith.constant 0 : index
    %c0_0 = arith.constant 0 : index
    %0 = vector.load %arg1[%c0, %c0_0] : memref<512x384xf32, #tpu.memory_space<vmem>>, vector<512x384xf32>
    %c0_1 = arith.constant 0 : index
    %c0_2 = arith.constant 0 : index
    %1 = vector.load %arg2[%c0_1, %c0_2] : memref<384x1xf32, #tpu.memory_space<vmem>>, vector<384x1xf32>
    %cst = arith.constant dense<0.000000e+00> : vector<512x1xf32>
    %2 = tpu.matmul %0, %1, %cst {dimension_numbers = #tpu.dot_dimension_numbers<[1], [0], [0], [1], [0, 0, 1, 1], [], []>} : vector<512x384xf32>, vector<384x1xf32>, vector<512x1xf32> -> vector<512x1xf32>
    %c0_3 = arith.constant 0 : index
    %c0_4 = arith.constant 0 : index
    %3 = vector.load %arg3[%c0_3, %c0_4] : memref<1x1xf32, #tpu.memory_space<vmem>>, vector<1x1xf32>
    %4 = vector.broadcast %3 : vector<1x1xf32> to vector<512x1xf32>
    %5 = arith.addf %2, %4 : vector<512x1xf32>
    %c0_5 = arith.constant 0 : index
    %c0_6 = arith.constant 0 : index
    %6 = vector.load %arg4[%c0_5, %c0_6] : memref<512x1xf32, #tpu.memory_space<vmem>>, vector<512x1xf32>
    tpu.vector_store %arg4[%c0_5, %c0_6], %5 {strides = array<i32>} : memref<512x1xf32, #tpu.memory_space<vmem>>, vector<512x1xf32>,
    return
  }
  func.func @transform_0(%arg0: i32) -> (i32, i32) {
    %c0_i32 = arith.constant 0 : i32
    %c0_i32_0 = arith.constant 0 : i32
    return %arg0, %c0_i32 : i32, i32
  }
  func.func @transform_1(%arg0: i32) -> (i32, i32) {
    %c0_i32 = arith.constant 0 : i32
    %c0_i32_0 = arith.constant 0 : i32
    %c0_i32_1 = arith.constant 0 : i32
    return %c0_i32, %c0_i32_0 : i32, i32
  }
  func.func @transform_2(%arg0: i32) -> (i32, i32) {
    %c0_i32 = arith.constant 0 : i32
    %c0_i32_0 = arith.constant 0 : i32
    %c0_i32_1 = arith.constant 0 : i32
    return %c0_i32, %c0_i32_0 : i32, i32
  }
  func.func @transform_3(%arg0: i32) -> (i32, i32) {
    %c0_i32 = arith.constant 0 : i32
    %c0_i32_0 = arith.constant 0 : i32
    return %arg0, %c0_i32 : i32, i32
  }
}

</mosaic_0001>

<bundles_post_ra>
// kernel: classifier_forward.1
= control target key start
LH: loop header
LB: loop body
LE: loop exit
PB: predicated region body
PF: predicated region fallthrough
CT: control target
= control target key end

     0   :  { %s3347_s0 = inlined_call_operand.hbm [shape: f32[1000,384], index: 0, kind: input, shape index: {}]   ;;  %s3348_s1 = inlined_call_operand.vmem [shape: f32[384,1], index: 1, kind: input, shape index: {}]   ;;  %s3349_s2 = inlined_call_operand.<no memory space> [shape: f32[1,1], index: 2, kind: input, shape index: {}]   ;;  %s3350_s3 = inlined_call_operand.vmem [shape: f32[1000,1], index: 3, kind: output, shape index: {}]  }
   0x1   :  { %v8_v0 = vstv %s3349_s2 }
   0x2   :  { %9 = vst [vmem:[#allocation2] sm:$0x1] %v8_v0 }
   0x3   :  { %10 = vsyncpa [#allocation4], 0 }
   0x4   :  { %12 = vsyncpa [#allocation4 + $0x1], 0  ;;  %s2328_s14 = smov 0   ;;  %s2330_s15 = smov 0  }
   0x5   :  { %s2332_s16 = smov 0   ;;  %s2334_s17 = smov 0  }
   0x6 LB: > { %s2347_s2 = sadd.s32 4294967295, %s2267_s17   ;;  %s2350_s18 = sadd.s32 1, %s2267_s17   ;;  %s2267_s17 = sphi %s2334_s17, %s3361_s17   ;;  %s2263_s16 = sphi %s2332_s16, %s3360_s16   ;;  %s2259_s15 = sphi %s2330_s15, %s3359_s15   ;;  %s2255_s14 = sphi %s2328_s14, %s3358_s14  }
   0x7   : > { %s22_s19 = ssub.s32 %s2267_s17, %s2350_s18  ;;  %s25_s20 = sadd.s32 1, %s2263_s16 }
   0x8   : > { %p23_p0 = scmp.eq.s32.totalorder %s22_s19, 0  ;;  %p32_p1 = scmp.ne.s32.totalorder %s2263_s16, %s2259_s15 }
   0x9   : > { %p33_p2 = scmp.eq.s32.totalorder %s2267_s17, 0  ;;  %p38_p3 = scmp.ne.s32.totalorder %s2259_s15, %s2255_s14 }
   0xa   : > { %s2360_s21 = scalar_select %p23_p0, %s2263_s16, %s25_s20  }
   0xb   : > { %p34_p4 = por %p33_p2, %p32_p1  ;;  %p39_p5 = scmp.eq.s32.totalorder %s2347_s2, 0 }
   0xc   : > { %p104_p6 = scmp.eq.s32.totalorder %s2347_s2, 1  ;;  %p1769_p9 = scmp.ge.s32.totalorder %s2267_s17, 2 }
   0xd   : > { %p2364_p7 = por %p39_p5, %p38_p3 }
   0xe   : > { %p2368_p8 = por %p104_p6, %p32_p1  ;;  %132 = sbr.rel (%p1769_p9) target bundleno = 53 (0x35), region = 24 }
  0x13   : > { %135 = sbr.rel (!%p34_p4) target bundleno = 53 (0x35), region = 28  ;;  %s136_s24 = sand.u32 (%p34_p4), 1, %s2263_s16  }
  0x14   : > { %s1770_s25 = sshll.u32 (%p34_p4), %s2267_s17, 6  ;;  %s2072_s26 = smul.u32 (%p34_p4), 1536, %s136_s24 }
  0x15   : > { %s142_s27 = ssub.s32 (%p34_p4), 125, %s1770_s25  ;;  %s2378_s30 = scalar_lea.sflag (%p34_p4), [#allocation4], %s136_s24 }
  0x16   : > { %p143_p10 = scmp.lt.s32.totalorder (%p34_p4), %s142_s27, 64  ;;  %s140_s4 = scalar_lea.vmem (%p34_p4), [#allocation3], %s2072_s26 }
  0x18   : > { %s3363_s27 = smov (!%p143_p10, %s142_s27), 64 }
  0x19   : > { %s2375_s28 = smul.u32 384, %s3363_s27 }
  0x1b   : > { %s148_s29 = ssub.s32 24576, %s2375_s28 }
  0x1c   : > { %149 = vsyncadd %s2378_s30, %s148_s29  ;;  %p1773_p11 = scmp.ne.s32.totalorder %s2375_s28, 0  ;;  %s2073_s5 = smul.u32 24576, %s2267_s17 }
  0x1d   : > { %s155_s6 = sshll.u32 %s140_s4, 4  ;;  %s2179_s13 = scalar_lea.hbm %s3347_s0, 48000  ;;  %s2388_s6 = int_to_ptr.vmem [resolvable:$true] %s155_s6 }
  0x1e   : > { %s2386_s9 = scalar_lea.hbm %s3347_s0, %s2073_s5 }
  0x1f   : > { %s2175_s10 = scalar_lea.hbm %s2386_s9, %s2375_s28  ;;  %p2180_p1 = scmp.lt.s32.totalorder %s2386_s9, %s3347_s0 }
  0x20   : > { %p2176_p12 = scmp.ne.s32.totalorder %s2386_s9, %s2175_s10  ;;  %p2181_p2 = scmp.lt.s32.totalorder %s2179_s13, %s2175_s10 }
  0x22   : > { %p2177_p13 = pnand %p2176_p12, %p1773_p11  ;;  %p2182_p3 = por %p2181_p2, %p2180_p1 }
  0x24   : > { %p2178_p0 = pneg %p2177_p13 }
  0x26   : > { %p2183_p4 = pnand %p2182_p3, %p2178_p0 }
  0x28   : > { %2186 = shalt.err (!%p2183_p4)
}
  0x29   : > { %s2187_s20 = scalar_lea.vmem %s2388_s6, %s2375_s28  ;;  %s2301_s24 = smov [#allocation3]  }
  0x2a   : > { %p2188_p5 = scmp.ne.s32.totalorder %s2388_s6, %s2187_s20  ;;  %s2191_s25 = sshll.u32 %s2301_s24, 4  ;;  %s2192_s25 = int_to_ptr.vmem [resolvable:$false] %s2191_s25 }
  0x2b   : > { %s2193_s26 = scalar_lea.vmem %s2192_s25, 49152  ;;  %p2194_p10 = scmp.lt.s32.totalorder %s2388_s6, %s2192_s25 }
  0x2c   : > { %p2189_p6 = pnand %p2188_p5, %p1773_p11  ;;  %p2195_p12 = scmp.lt.s32.totalorder %s2193_s26, %s2187_s20 }
  0x2e   : > { %p2190_p9 = pneg %p2189_p6  ;;  %p2196_p13 = por %p2195_p12, %p2194_p10 }
  0x30   : > { %p2197_p1 = pnand %p2196_p13, %p2190_p9 }
  0x32   : > { %2200 = shalt.err (!%p2197_p1)
}
  0x33   : > { %s2302_s27 = smov 384   ;;  %s2303_s29 = smov 24  }
  0x34   : > { %161 = dma.hbm_to_vmem [thread:$0]  (%p1773_p11), %s2386_s9, %s2375_s28, %s2388_s6, %s2378_s30, %s2302_s27, %s2302_s27, %s2303_s29  }
  0x35 PF: > { %p1777_p0 = scmp.ge.s32.totalorder %s2267_s17, 1  ;;  %p163_p2 = scmp.lt.s32.totalorder %s2267_s17, 3 }
  0x37   : > { %p164_p3 = pnand %p1777_p0, %p163_p2 }
  0x38   : > { %s2417_s4 = sand.u32 (!%p164_p3), 1, %s2259_s15  }
  0x39   : > { %167 = sbr.rel (%p164_p3) target bundleno = 579 (0x243), region = 32  ;;  %s170_s7 = scalar_lea.sflag (!%p164_p3), [#allocation4], %s2417_s4 }
  0x3a   : > { %s2074_s5 = smul.u32 (!%p164_p3), 1536, %s2417_s4 }
  0x3c   : > { %s2421_s8 = scalar_lea.vmem (!%p164_p3), [#allocation3], %s2074_s5 }
  0x3e   : > { %2250 = dma.done.wait (%p2364_p7), %s170_s7, 24576  }
  0x3f   : > { %2252 = vsyncadd (%p2364_p7), %s170_s7, 4294942720  ;;  %v2304_v1 = vmov 0.0   ;;  %v413_v2 = vld [vmem:[%s3348_s1 + $0x78] sm:$0xff]  ;;  %v412_v3 = vld [vmem:[%s3348_s1 + $0x70] sm:$0xff]  ;;  %vm1223_vm0 = vcmask 7168   ;;  %s1797_s29 = sshll.u32 (%p2368_p8), %s2347_s2, 9 }
  0x40   : > { %453 = vmatprep.subr.mxu0 %v2304_v1  ;;  %2008 = vmatprep.subr.mxu1 %v2304_v1  ;;  %v411_v4 = vld [vmem:[%s3348_s1 + $0x68] sm:$0xff]  ;;  %v410_v5 = vld [vmem:[%s3348_s1 + $0x60] sm:$0xff]  ;;  %v409_v6 = vld [vmem:[%s3348_s1 + $0x58] sm:$0xff]  ;;  %s3145_s28 = scalar_lea.vmem (%p2368_p8), %s3350_s3, %s1797_s29  }
  0x41   : > { %454 = vmatpush1.msra.mxu0 %v413_v2  ;;  %2040 = vmatpush1.msra.mxu1 %v413_v2  ;;  %v408_v7 = vld [vmem:[%s3348_s1 + $0x50] sm:$0xff]  ;;  %v407_v8 = vld [vmem:[%s3348_s1 + $0x48] sm:$0xff]  ;;  %v406_v9 = vld [vmem:[%s3348_s1 + $0x40] sm:$0xff] }
  0x42   : > { %455 = vmatprep.subr.mxu0 %v2304_v1  ;;  %2009 = vmatprep.subr.mxu1 %v2304_v1  ;;  %v405_v10 = vld [vmem:[%s3348_s1 + $0x38] sm:$0xff]  ;;  %v404_v11 = vld [vmem:[%s3348_s1 + $0x30] sm:$0xff]  ;;  %v403_v12 = vld [vmem:[%s3348_s1 + $0x28] sm:$0xff] }
  0x43   : > { %456 = vmatpush1.msra.mxu0 %v412_v3  ;;  %2041 = vmatpush1.msra.mxu1 %v412_v3  ;;  %v402_v13 = vld [vmem:[%s3348_s1 + $0x20] sm:$0xff]  ;;  %v401_v14 = vld [vmem:[%s3348_s1 + $0x18] sm:$0xff]  ;;  %v400_v15 = vld [vmem:[%s3348_s1 + $0x10] sm:$0xff] }
  0x44   : > { %457 = vmatprep.subr.mxu0 %v2304_v1  ;;  %2010 = vmatprep.subr.mxu1 %v2304_v1  ;;  %v399_v16 = vld [vmem:[%s3348_s1 + $0x8] sm:$0xff]  ;;  %v398_v17 = vld [vmem:[%s3348_s1] sm:$0xff]  ;;  %v429_v18 = vld [vmem:[%s3348_s1 + $0xf8] sm:$0xff] }
  0x45   : > { %458 = vmatpush1.msra.mxu0 %v411_v4  ;;  %2042 = vmatpush1.msra.mxu1 %v411_v4  ;;  %v428_v19 = vld [vmem:[%s3348_s1 + $0xf0] sm:$0xff]  ;;  %v427_v20 = vld [vmem:[%s3348_s1 + $0xe8] sm:$0xff]  ;;  %v426_v21 = vld [vmem:[%s3348_s1 + $0xe0] sm:$0xff] }
  0x46   : > { %459 = vmatprep.subr.mxu0 %v2304_v1  ;;  %2011 = vmatprep.subr.mxu1 %v2304_v1  ;;  %v425_v22 = vld [vmem:[%s3348_s1 + $0xd8] sm:$0xff]  ;;  %v424_v23 = vld [vmem:[%s3348_s1 + $0xd0] sm:$0xff]  ;;  %v423_v24 = vld [vmem:[%s3348_s1 + $0xc8] sm:$0xff] }
  0x47   : > { %460 = vmatpush1.msra.mxu0 %v410_v5  ;;  %2043 = vmatpush1.msra.mxu1 %v410_v5  ;;  %v422_v25 = vld [vmem:[%s3348_s1 + $0xc0] sm:$0xff]  ;;  %v421_v26 = vld [vmem:[%s3348_s1 + $0xb8] sm:$0xff]  ;;  %v420_v27 = vld [vmem:[%s3348_s1 + $0xb0] sm:$0xff] }
  0x48   : > { %461 = vmatprep.subr.mxu0 %v2304_v1  ;;  %2012 = vmatprep.subr.mxu1 %v2304_v1  ;;  %v419_v28 = vld [vmem:[%s3348_s1 + $0xa8] sm:$0xff]  ;;  %v418_v29 = vld [vmem:[%s3348_s1 + $0xa0] sm:$0xff]  ;;  %v417_v30 = vld [vmem:[%s3348_s1 + $0x98] sm:$0xff] }
  0x49   : > { %462 = vmatpush1.msra.mxu0 %v409_v6  ;;  %2044 = vmatpush1.msra.mxu1 %v409_v6  ;;  %v416_v31 = vld [vmem:[%s3348_s1 + $0x90] sm:$0xff]  ;;  %v415_v32 = vld [vmem:[%s3348_s1 + $0x88] sm:$0xff]  ;;  %v414_v33 = vld [vmem:[%s3348_s1 + $0x80] sm:$0xff] }
  0x4a   : > { %463 = vmatprep.subr.mxu0 %v2304_v1  ;;  %2013 = vmatprep.subr.mxu1 %v2304_v1  ;;  %v207_v34 = vld [vmem:[%s2421_s8 + $0x8] sm:$0xff]  ;;  %v206_v36 = vld [vmem:[%s2421_s8] sm:$0xff]  ;;  %v445_v38 = vld [vmem:[%s3348_s1 + $0x178] sm:$0xff] }
  0x4b   : > { %464 = vmatpush1.msra.mxu0 %v408_v7  ;;  %2045 = vmatpush1.msra.mxu1 %v408_v7  ;;  %v351_v35 = vld [vmem:[%s2421_s8 + $0x488] sm:$0xff]  ;;  %v350_v37 = vld [vmem:[%s2421_s8 + $0x480] sm:$0xff]  ;;  %v209_v42 = vld [vmem:[%s2421_s8 + $0x18] sm:$0xff] }
  0x4c   : > { %465 = vmatprep.subr.mxu0 %v2304_v1  ;;  %2014 = vmatprep.subr.mxu1 %v2304_v1  ;;  %v210_v39 = vld [vmem:[%s2421_s8 + $0x20] sm:$0xff]  ;;  %v444_v41 = vld [vmem:[%s3348_s1 + $0x170] sm:$0xff]  ;;  %v353_v43 = vld [vmem:[%s2421_s8 + $0x498] sm:$0xff] }
  0x4d   : > { %466 = vmatpush1.msra.mxu0 %v407_v8  ;;  %2046 = vmatpush1.msra.mxu1 %v407_v8  ;;  %v354_v40 = vld [vmem:[%s2421_s8 + $0x4a0] sm:$0xff]  ;;  %v213_v44 = vld [vmem:[%s2421_s8 + $0x38] sm:$0xff]  ;;  %v212_v47 = vld [vmem:[%s2421_s8 + $0x30] sm:$0xff] }
  0x4e   : > { %467 = vmatprep.subr.mxu0 %v2304_v1  ;;  %2015 = vmatprep.subr.mxu1 %v2304_v1  ;;  %v357_v45 = vld [vmem:[%s2421_s8 + $0x4b8] sm:$0xff]  ;;  %v443_v46 = vld [vmem:[%s3348_s1 + $0x168] sm:$0xff]  ;;  %v356_v48 = vld [vmem:[%s2421_s8 + $0x4b0] sm:$0xff] }
  0x4f   : > { %468 = vmatpush1.msra.mxu0 %v406_v9  ;;  %2047 = vmatpush1.msra.mxu1 %v406_v9  ;;  %v216_v49 = vld [vmem:[%s2421_s8 + $0x50] sm:$0xff]  ;;  %v442_v51 = vld [vmem:[%s3348_s1 + $0x160] sm:$0xff]  ;;  %v215_v52 = vld [vmem:[%s2421_s8 + $0x48] sm:$0xff] }
  0x50   : > { %469 = vmatprep.subr.mxu0 %v2304_v1  ;;  %2016 = vmatprep.subr.mxu1 %v2304_v1  ;;  %v360_v50 = vld [vmem:[%s2421_s8 + $0x4d0] sm:$0xff]  ;;  %v359_v53 = vld [vmem:[%s2421_s8 + $0x4c8] sm:$0xff]  ;;  %v218_v57 = vld [vmem:[%s2421_s8 + $0x60] sm:$0xff] }
  0x51   : > { %470 = vmatpush1.msra.mxu0 %v405_v10  ;;  %2048 = vmatpush1.msra.mxu1 %v405_v10  ;;  %v219_v54 = vld [vmem:[%s2421_s8 + $0x68] sm:$0xff]  ;;  %v441_v56 = vld [vmem:[%s3348_s1 + $0x158] sm:$0xff]  ;;  %v362_v58 = vld [vmem:[%s2421_s8 + $0x4e0] sm:$0xff] }
  0x52   : > { %471 = vmatprep.subr.mxu0 %v2304_v1  ;;  %2017 = vmatprep.subr.mxu1 %v2304_v1  ;;  %v363_v55 = vld [vmem:[%s2421_s8 + $0x4e8] sm:$0xff]  ;;  %v222_v59 = vld [vmem:[%s2421_s8 + $0x80] sm:$0xff]  ;;  %v221_v62 = vld [vmem:[%s2421_s8 + $0x78] sm:$0xff] }
  0x53   : > { %472 = vmatpush1.msra.mxu0 %v404_v11  ;;  %2049 = vmatpush1.msra.mxu1 %v404_v11  ;;  %v366_v60 = vld [vmem:[%s2421_s8 + $0x500] sm:$0xff]  ;;  %v440_v61 = vld [vmem:[%s3348_s1 + $0x150] sm:$0xff]  ;;  %v365_v63 = vld [vmem:[%s2421_s8 + $0x4f8] sm:$0xff] }
  0x54   : > { %473 = vmatprep.subr.mxu0 %v2304_v1  ;;  %2018 = vmatprep.subr.mxu1 %v2304_v1  ;;  %v225_v0 = vld [vmem:[%s2421_s8 + $0x98] sm:$0xff]  ;;  %v439_v2 = vld [vmem:[%s3348_s1 + $0x148] sm:$0xff]  ;;  %v224_v3 = vld [vmem:[%s2421_s8 + $0x90] sm:$0xff] }
  0x55   : > { %474 = vmatpush1.msra.mxu0 %v403_v12  ;;  %2050 = vmatpush1.msra.mxu1 %v403_v12  ;;  %v368_v4 = vld [vmem:[%s2421_s8 + $0x510] sm:$0xff]  ;;  %v438_v7 = vld [vmem:[%s3348_s1 + $0x140] sm:$0xff]  ;;  %v227_v8 = vld [vmem:[%s2421_s8 + $0xa8] sm:$0xff] }
  0x56   : > { %475 = vmatprep.subr.mxu0 %v2304_v1  ;;  %2019 = vmatprep.subr.mxu1 %v2304_v1  ;;  %v228_v5 = vld [vmem:[%s2421_s8 + $0xb0] sm:$0xff]  ;;  %v371_v9 = vld [vmem:[%s2421_s8 + $0x528] sm:$0xff] }
  0x57   : > { %476 = vmatpush1.msra.mxu0 %v402_v13  ;;  %2051 = vmatpush1.msra.mxu1 %v402_v13  ;;  %v372_v6 = vld [vmem:[%s2421_s8 + $0x530] sm:$0xff]  ;;  %v231_v10 = vld [vmem:[%s2421_s8 + $0xc8] sm:$0xff]  ;;  %v230_v13 = vld [vmem:[%s2421_s8 + $0xc0] sm:$0xff] }
  0x58   : > { %477 = vmatprep.subr.mxu0 %v2304_v1  ;;  %2020 = vmatprep.subr.mxu1 %v2304_v1  ;;  %v375_v11 = vld [vmem:[%s2421_s8 + $0x548] sm:$0xff]  ;;  %v437_v12 = vld [vmem:[%s3348_s1 + $0x138] sm:$0xff] }
  0x59   : > { %478 = vmatpush1.msra.mxu0 %v401_v14  ;;  %2052 = vmatpush1.msra.mxu1 %v401_v14  ;;  %v374_v14 = vld [vmem:[%s2421_s8 + $0x540] sm:$0xff] }
  0x5a   : > { %479 = vmatprep.subr.mxu0 %v2304_v1  ;;  %2021 = vmatprep.subr.mxu1 %v2304_v1 }
  0x5b   : > { %480 = vmatpush1.msra.mxu0 %v400_v15  ;;  %2053 = vmatpush1.msra.mxu1 %v400_v15  ;;  %v234_v15 = vld [vmem:[%s2421_s8 + $0xe0] sm:$0xff] }
  0x5c   : > { %481 = vmatprep.subr.mxu0 %v2304_v1  ;;  %2022 = vmatprep.subr.mxu1 %v2304_v1 }
  0x5d   : > { %482 = vmatpush1.msra.mxu0 %v399_v16  ;;  %2054 = vmatpush1.msra.mxu1 %v399_v16  ;;  %v378_v16 = vld [vmem:[%s2421_s8 + $0x560] sm:$0xff] }
  0x5e   : > { %483 = vmatprep.subr.mxu0 %v2304_v1  ;;  %2023 = vmatprep.subr.mxu1 %v2304_v1 }
  0x5f   : > { %484 = vmatpush1.msra.mxu0 %v398_v17  ;;  %2055 = vmatpush1.msra.mxu1 %v398_v17  ;;  %v436_v17 = vld [vmem:[%s3348_s1 + $0x130] sm:$0xff] }
  0x60   : > { %485 = vmatprep.subr.mxu0 %v2304_v1  ;;  %2024 = vmatprep.subr.mxu1 %v2304_v1 }
  0x61   : > { %486 = vmatpush2.msra.mxu0 %v429_v18  ;;  %2056 = vmatpush2.msra.mxu1 %v429_v18  ;;  %v233_v18 = vld [vmem:[%s2421_s8 + $0xd8] sm:$0xff] }
  0x62   : > { %487 = vmatprep.subr.mxu0 %v2304_v1  ;;  %2025 = vmatprep.subr.mxu1 %v2304_v1 }
  0x63   : > { %488 = vmatpush2.msra.mxu0 %v428_v19  ;;  %2057 = vmatpush2.msra.mxu1 %v428_v19  ;;  %v377_v19 = vld [vmem:[%s2421_s8 + $0x558] sm:$0xff] }
  0x64   : > { %489 = vmatprep.subr.mxu0 %v2304_v1  ;;  %2026 = vmatprep.subr.mxu1 %v2304_v1 }
  0x65   : > { %490 = vmatpush2.msra.mxu0 %v427_v20  ;;  %2058 = vmatpush2.msra.mxu1 %v427_v20  ;;  %v237_v20 = vld [vmem:[%s2421_s8 + $0xf8] sm:$0xff] }
  0x66   : > { %491 = vmatprep.subr.mxu0 %v2304_v1  ;;  %2027 = vmatprep.subr.mxu1 %v2304_v1 }
  0x67   : > { %492 = vmatpush2.msra.mxu0 %v426_v21  ;;  %2059 = vmatpush2.msra.mxu1 %v426_v21  ;;  %v381_v21 = vld [vmem:[%s2421_s8 + $0x578] sm:$0xff] }
  0x68   : > { %493 = vmatprep.subr.mxu0 %v2304_v1  ;;  %2028 = vmatprep.subr.mxu1 %v2304_v1 }
  0x69   : > { %494 = vmatpush2.msra.mxu0 %v425_v22  ;;  %2060 = vmatpush2.msra.mxu1 %v425_v22  ;;  %v435_v22 = vld [vmem:[%s3348_s1 + $0x128] sm:$0xff] }
  0x6a   : > { %495 = vmatprep.subr.mxu0 %v2304_v1  ;;  %2029 = vmatprep.subr.mxu1 %v2304_v1 }
  0x6b   : > { %496 = vmatpush2.msra.mxu0 %v424_v23  ;;  %2061 = vmatpush2.msra.mxu1 %v424_v23  ;;  %v236_v23 = vld [vmem:[%s2421_s8 + $0xf0] sm:$0xff] }
  0x6c   : > { %497 = vmatprep.subr.mxu0 %v2304_v1  ;;  %2030 = vmatprep.subr.mxu1 %v2304_v1 }
  0x6d   : > { %498 = vmatpush2.msra.mxu0 %v423_v24  ;;  %2062 = vmatpush2.msra.mxu1 %v423_v24  ;;  %v380_v24 = vld [vmem:[%s2421_s8 + $0x570] sm:$0xff] }
  0x6e   : > { %499 = vmatprep.subr.mxu0 %v2304_v1  ;;  %2031 = vmatprep.subr.mxu1 %v2304_v1 }
  0x6f   : > { %500 = vmatpush2.msra.mxu0 %v422_v25  ;;  %2063 = vmatpush2.msra.mxu1 %v422_v25  ;;  %v240_v25 = vld [vmem:[%s2421_s8 + $0x110] sm:$0xff] }
  0x70   : > { %501 = vmatprep.subr.mxu0 %v2304_v1  ;;  %2032 = vmatprep.subr.mxu1 %v2304_v1 }
  0x71   : > { %502 = vmatpush2.msra.mxu0 %v421_v26  ;;  %2064 = vmatpush2.msra.mxu1 %v421_v26  ;;  %v384_v26 = vld [vmem:[%s2421_s8 + $0x590] sm:$0xff] }
  0x72   : > { %503 = vmatprep.subr.mxu0 %v2304_v1  ;;  %2033 = vmatprep.subr.mxu1 %v2304_v1 }
  0x73   : > { %504 = vmatpush2.msra.mxu0 %v420_v27  ;;  %2065 = vmatpush2.msra.mxu1 %v420_v27  ;;  %v434_v27 = vld [vmem:[%s3348_s1 + $0x120] sm:$0xff] }
  0x74   : > { %505 = vmatprep.subr.mxu0 %v2304_v1  ;;  %2034 = vmatprep.subr.mxu1 %v2304_v1 }
  0x75   : > { %506 = vmatpush2.msra.mxu0 %v419_v28  ;;  %2066 = vmatpush2.msra.mxu1 %v419_v28  ;;  %v239_v28 = vld [vmem:[%s2421_s8 + $0x108] sm:$0xff] }
  0x76   : > { %507 = vmatprep.subr.mxu0 %v2304_v1  ;;  %2035 = vmatprep.subr.mxu1 %v2304_v1 }
  0x77   : > { %508 = vmatpush2.msra.mxu0 %v418_v29  ;;  %2067 = vmatpush2.msra.mxu1 %v418_v29  ;;  %v383_v29 = vld [vmem:[%s2421_s8 + $0x588] sm:$0xff] }
  0x78   : > { %509 = vmatprep.subr.mxu0 %v2304_v1  ;;  %2036 = vmatprep.subr.mxu1 %v2304_v1 }
  0x79   : > { %510 = vmatpush2.msra.mxu0 %v417_v30  ;;  %2068 = vmatpush2.msra.mxu1 %v417_v30  ;;  %v243_v30 = vld [vmem:[%s2421_s8 + $0x128] sm:$0xff] }
  0x7a   : > { %511 = vmatprep.subr.mxu0 %v2304_v1  ;;  %2037 = vmatprep.subr.mxu1 %v2304_v1 }
  0x7b   : > { %512 = vmatpush2.msra.mxu0 %v416_v31  ;;  %2069 = vmatpush2.msra.mxu1 %v416_v31  ;;  %v387_v31 = vld [vmem:[%s2421_s8 + $0x5a8] sm:$0xff] }
  0x7c   : > { %513 = vmatprep.subr.mxu0 %v2304_v1  ;;  %2038 = vmatprep.subr.mxu1 %v2304_v1 }
  0x7d   : > { %514 = vmatpush2.msra.mxu0 %v415_v32  ;;  %2070 = vmatpush2.msra.mxu1 %v415_v32  ;;  %v433_v32 = vld [vmem:[%s3348_s1 + $0x118] sm:$0xff] }
  0x7e   : > { %515 = vmatprep.subr.mxu0 %v2304_v1  ;;  %2039 = vmatprep.subr.mxu1 %v2304_v1  ;;  %v369_v1 = vld [vmem:[%s2421_s8 + $0x518] sm:$0xff] }
  0x7f   : > { %516 = vmatpush2.msra.mxu0 %v414_v33  ;;  %2071 = vmatpush2.msra.mxu1 %v414_v33  ;;  %v242_v33 = vld [vmem:[%s2421_s8 + $0x120] sm:$0xff] }
  0x80   : > { %517 = vmatprep.mubr.f32.mxu0 %v207_v34  ;;  %757 = vmatprep.mubr.f32.mxu1 %v351_v35  ;;  %v386_v34 = vld [vmem:[%s2421_s8 + $0x5a0] sm:$0xff] }
  0x81   : > { %518 = vmatmul.mubr.f32.vlgmr.msra.gmra.mxu0 %v206_v36  ;;  %758 = vmatmul.mubr.f32.vlgmr.msra.gmra.mxu1 %v350_v37  ;;  %v246_v35 = vld [vmem:[%s2421_s8 + $0x140] sm:$0xff]  ;;  %v432_v37 = vld [vmem:[%s3348_s1 + $0x110] sm:$0xff] }
  0x82   : > { %1880 = vmatprep.subr.mxu1 %v445_v38  ;;  %522 = vmatprep.mubr.f32.mxu0 %v210_v39  ;;  %v390_v36 = vld [vmem:[%s2421_s8 + $0x5c0] sm:$0xff]  ;;  %v389_v39 = vld [vmem:[%s2421_s8 + $0x5b8] sm:$0xff] }
  0x83   : > { %1881 = vmatpush3.msra.mxu1 %v445_v38  ;;  %762 = vmatprep.mubr.f32.mxu1 %v354_v40  ;;  %v245_v38 = vld [vmem:[%s2421_s8 + $0x138] sm:$0xff] }
  0x84   : > { %1882 = vmatprep.subr.mxu1 %v444_v41  ;;  %v249_v40 = vld [vmem:[%s2421_s8 + $0x158] sm:$0xff] }
  0x85   : > { %523 = vmatmul.mubr.f32.gmra.mxu0 %v209_v42  ;;  %763 = vmatmul.mubr.f32.gmra.mxu1 %v353_v43  ;;  %v431_v42 = vld [vmem:[%s3348_s1 + $0x108] sm:$0xff]  ;;  %v248_v43 = vld [vmem:[%s2421_s8 + $0x150] sm:$0xff] }
  0x86   : > { %1883 = vmatpush3.msra.mxu1 %v444_v41  ;;  %527 = vmatprep.mubr.f32.mxu0 %v213_v44  ;;  %v393_v41 = vld [vmem:[%s2421_s8 + $0x5d8] sm:$0xff]  ;;  %v392_v44 = vld [vmem:[%s2421_s8 + $0x5d0] sm:$0xff] }
  0x87   : > { %767 = vmatprep.mubr.f32.mxu1 %v357_v45  ;;  %1884 = vmatprep.subr.mxu1 %v443_v46  ;;  %v252_v45 = vld [vmem:[%s2421_s8 + $0x170] sm:$0xff] }
  0x88   : > { %1885 = vmatpush3.msra.mxu1 %v443_v46  ;;  %v396_v46 = vld [vmem:[%s2421_s8 + $0x5f0] sm:$0xff] }
  0x89   : > { %528 = vmatmul.mubr.f32.gmra.mxu0 %v212_v47  ;;  %768 = vmatmul.mubr.f32.gmra.mxu1 %v356_v48  ;;  %v430_v47 = vld [vmem:[%s3348_s1 + $0x100] sm:$0xff]  ;;  %v251_v48 = vld [vmem:[%s2421_s8 + $0x168] sm:$0xff] }
  0x8a   : > { %532 = vmatprep.mubr.f32.mxu0 %v216_v49  ;;  %772 = vmatprep.mubr.f32.mxu1 %v360_v50  ;;  %v395_v49 = vld [vmem:[%s2421_s8 + $0x5e8] sm:$0xff] }
  0x8b   : > { %1886 = vmatprep.subr.mxu1 %v442_v51  ;;  %v255_v50 = vld [vmem:[%s2421_s8 + $0x188] sm:$0xff] }
  0x8c   : > { %1887 = vmatpush3.msra.mxu1 %v442_v51  ;;  %v208_v51 = vld [vmem:[%s2421_s8 + $0x10] sm:$0xff] }
  0x8d   : > { %533 = vmatmul.mubr.f32.gmra.mxu0 %v215_v52  ;;  %773 = vmatmul.mubr.f32.gmra.mxu1 %v359_v53  ;;  %v254_v52 = vld [vmem:[%s2421_s8 + $0x180] sm:$0xff]  ;;  %v211_v53 = vld [vmem:[%s2421_s8 + $0x28] sm:$0xff] }
  0x8e   : > { %537 = vmatprep.mubr.f32.mxu0 %v219_v54  ;;  %777 = vmatprep.mubr.f32.mxu1 %v363_v55  ;;  %v258_v54 = vld [vmem:[%s2421_s8 + $0x1a0] sm:$0xff] }
  0x8f   : > { %1888 = vmatprep.subr.mxu1 %v441_v56  ;;  %v214_v55 = vld [vmem:[%s2421_s8 + $0x40] sm:$0xff] }
  0x90   : > { %1889 = vmatpush3.msra.mxu1 %v441_v56  ;;  %v257_v56 = vld [vmem:[%s2421_s8 + $0x198] sm:$0xff] }
  0x91   : > { %538 = vmatmul.mubr.f32.gmra.mxu0 %v218_v57  ;;  %778 = vmatmul.mubr.f32.gmra.mxu1 %v362_v58  ;;  %v217_v57 = vld [vmem:[%s2421_s8 + $0x58] sm:$0xff] }
  0x92   : > { %542 = vmatprep.mubr.f32.mxu0 %v222_v59  ;;  %782 = vmatprep.mubr.f32.mxu1 %v366_v60  ;;  %v261_v58 = vld [vmem:[%s2421_s8 + $0x1b8] sm:$0xff]  ;;  %v220_v59 = vld [vmem:[%s2421_s8 + $0x70] sm:$0xff] }
  0x93   : > { %1890 = vmatprep.subr.mxu1 %v440_v61  ;;  %v260_v60 = vld [vmem:[%s2421_s8 + $0x1b0] sm:$0xff] }
  0x94   : > { %1891 = vmatpush3.msra.mxu1 %v440_v61  ;;  %v223_v61 = vld [vmem:[%s2421_s8 + $0x88] sm:$0xff] }
  0x95   : > { %543 = vmatmul.mubr.f32.gmra.mxu0 %v221_v62  ;;  %783 = vmatmul.mubr.f32.gmra.mxu1 %v365_v63  ;;  %v264_v62 = vld [vmem:[%s2421_s8 + $0x1d0] sm:$0xff]  ;;  %v226_v63 = vld [vmem:[%s2421_s8 + $0xa0] sm:$0xff] }
  0x96   : > { %547 = vmatprep.mubr.f32.mxu0 %v225_v0  ;;  %787 = vmatprep.mubr.f32.mxu1 %v369_v1  ;;  %v263_v0 = vld [vmem:[%s2421_s8 + $0x1c8] sm:$0xff]  ;;  %v229_v1 = vld [vmem:[%s2421_s8 + $0xb8] sm:$0xff] }
  0x97   : > { %1892 = vmatprep.subr.mxu1 %v439_v2 }
  0x98   : > { %1893 = vmatpush3.msra.mxu1 %v439_v2  ;;  %v267_v2 = vld [vmem:[%s2421_s8 + $0x1e8] sm:$0xff] }
  0x99   : > { %548 = vmatmul.mubr.f32.gmra.mxu0 %v224_v3  ;;  %788 = vmatmul.mubr.f32.gmra.mxu1 %v368_v4  ;;  %v232_v3 = vld [vmem:[%s2421_s8 + $0xd0] sm:$0xff]  ;;  %v266_v4 = vld [vmem:[%s2421_s8 + $0x1e0] sm:$0xff] }
  0x9a   : > { %552 = vmatprep.mubr.f32.mxu0 %v228_v5  ;;  %792 = vmatprep.mubr.f32.mxu1 %v372_v6  ;;  %v235_v5 = vld [vmem:[%s2421_s8 + $0xe8] sm:$0xff]  ;;  %v270_v6 = vld [vmem:[%s2421_s8 + $0x200] sm:$0xff] }
  0x9b   : > { %1894 = vmatprep.subr.mxu1 %v438_v7 }
  0x9c   : > { %1895 = vmatpush3.msra.mxu1 %v438_v7  ;;  %v238_v7 = vld [vmem:[%s2421_s8 + $0x100] sm:$0xff] }
  0x9d   : > { %553 = vmatmul.mubr.f32.gmra.mxu0 %v227_v8  ;;  %793 = vmatmul.mubr.f32.gmra.mxu1 %v371_v9  ;;  %v269_v8 = vld [vmem:[%s2421_s8 + $0x1f8] sm:$0xff] }
  0x9e   : > { %557 = vmatprep.mubr.f32.mxu0 %v231_v10  ;;  %797 = vmatprep.mubr.f32.mxu1 %v375_v11  ;;  %v241_v9 = vld [vmem:[%s2421_s8 + $0x118] sm:$0xff]  ;;  %v244_v11 = vld [vmem:[%s2421_s8 + $0x130] sm:$0xff] }
  0x9f   : > { %1896 = vmatprep.subr.mxu1 %v437_v12  ;;  %v273_v10 = vld [vmem:[%s2421_s8 + $0x218] sm:$0xff] }
  0xa0   : > { %1897 = vmatpush3.msra.mxu1 %v437_v12  ;;  %v272_v12 = vld [vmem:[%s2421_s8 + $0x210] sm:$0xff] }
  0xa1   : > { %558 = vmatmul.mubr.f32.gmra.mxu0 %v230_v13  ;;  %798 = vmatmul.mubr.f32.gmra.mxu1 %v374_v14  ;;  %v247_v13 = vld [vmem:[%s2421_s8 + $0x148] sm:$0xff]  ;;  %v276_v14 = vld [vmem:[%s2421_s8 + $0x230] sm:$0xff] }
  0xa2   : > { %562 = vmatprep.mubr.f32.mxu0 %v234_v15  ;;  %802 = vmatprep.mubr.f32.mxu1 %v378_v16  ;;  %v250_v15 = vld [vmem:[%s2421_s8 + $0x160] sm:$0xff]  ;;  %v275_v16 = vld [vmem:[%s2421_s8 + $0x228] sm:$0xff] }
  0xa3   : > { %1898 = vmatprep.subr.mxu1 %v436_v17 }
  0xa4   : > { %1899 = vmatpush3.msra.mxu1 %v436_v17  ;;  %v253_v17 = vld [vmem:[%s2421_s8 + $0x178] sm:$0xff] }
  0xa5   : > { %563 = vmatmul.mubr.f32.gmra.mxu0 %v233_v18  ;;  %803 = vmatmul.mubr.f32.gmra.mxu1 %v377_v19  ;;  %v279_v18 = vld [vmem:[%s2421_s8 + $0x248] sm:$0xff]  ;;  %v256_v19 = vld [vmem:[%s2421_s8 + $0x190] sm:$0xff] }
  0xa6   : > { %567 = vmatprep.mubr.f32.mxu0 %v237_v20  ;;  %807 = vmatprep.mubr.f32.mxu1 %v381_v21  ;;  %v278_v20 = vld [vmem:[%s2421_s8 + $0x240] sm:$0xff]  ;;  %v259_v21 = vld [vmem:[%s2421_s8 + $0x1a8] sm:$0xff] }
  0xa7   : > { %1900 = vmatprep.subr.mxu1 %v435_v22 }
  0xa8   : > { %1901 = vmatpush3.msra.mxu1 %v435_v22  ;;  %v282_v22 = vld [vmem:[%s2421_s8 + $0x260] sm:$0xff] }
  0xa9   : > { %568 = vmatmul.mubr.f32.gmra.mxu0 %v236_v23  ;;  %808 = vmatmul.mubr.f32.gmra.mxu1 %v380_v24  ;;  %v262_v23 = vld [vmem:[%s2421_s8 + $0x1c0] sm:$0xff]  ;;  %v281_v24 = vld [vmem:[%s2421_s8 + $0x258] sm:$0xff] }
  0xaa   : > { %572 = vmatprep.mubr.f32.mxu0 %v240_v25  ;;  %812 = vmatprep.mubr.f32.mxu1 %v384_v26  ;;  %v265_v25 = vld [vmem:[%s2421_s8 + $0x1d8] sm:$0xff] }
  0xab   : > { %1902 = vmatprep.subr.mxu1 %v434_v27  ;;  %v285_v26 = vld [vmem:[%s2421_s8 + $0x278] sm:$0xff] }
  0xac   : > { %1903 = vmatpush3.msra.mxu1 %v434_v27  ;;  %v268_v27 = vld [vmem:[%s2421_s8 + $0x1f0] sm:$0xff] }
  0xad   : > { %573 = vmatmul.mubr.f32.gmra.mxu0 %v239_v28  ;;  %813 = vmatmul.mubr.f32.gmra.mxu1 %v383_v29  ;;  %v284_v28 = vld [vmem:[%s2421_s8 + $0x270] sm:$0xff]  ;;  %v271_v29 = vld [vmem:[%s2421_s8 + $0x208] sm:$0xff] }
  0xae   : > { %577 = vmatprep.mubr.f32.mxu0 %v243_v30  ;;  %817 = vmatprep.mubr.f32.mxu1 %v387_v31  ;;  %v288_v30 = vld [vmem:[%s2421_s8 + $0x290] sm:$0xff]  ;;  %v274_v31 = vld [vmem:[%s2421_s8 + $0x220] sm:$0xff] }
  0xaf   : > { %1904 = vmatprep.subr.mxu1 %v433_v32 }
  0xb0   : > { %1905 = vmatpush3.msra.mxu1 %v433_v32  ;;  %v287_v32 = vld [vmem:[%s2421_s8 + $0x288] sm:$0xff] }
  0xb1   : > { %578 = vmatmul.mubr.f32.gmra.mxu0 %v242_v33  ;;  %818 = vmatmul.mubr.f32.gmra.mxu1 %v386_v34  ;;  %v277_v33 = vld [vmem:[%s2421_s8 + $0x238] sm:$0xff]  ;;  %v291_v34 = vld [vmem:[%s2421_s8 + $0x2a8] sm:$0xff] }
  0xb2   : > { %582 = vmatprep.mubr.f32.mxu0 %v246_v35  ;;  %822 = vmatprep.mubr.f32.mxu1 %v390_v36  ;;  %v280_v35 = vld [vmem:[%s2421_s8 + $0x250] sm:$0xff]  ;;  %v290_v36 = vld [vmem:[%s2421_s8 + $0x2a0] sm:$0xff] }
  0xb3   : > { %1906 = vmatprep.subr.mxu1 %v432_v37 }
  0xb4   : > { %1907 = vmatpush3.msra.mxu1 %v432_v37  ;;  %v283_v37 = vld [vmem:[%s2421_s8 + $0x268] sm:$0xff] }
  0xb5   : > { %583 = vmatmul.mubr.f32.gmra.mxu0 %v245_v38  ;;  %823 = vmatmul.mubr.f32.gmra.mxu1 %v389_v39  ;;  %v294_v38 = vld [vmem:[%s2421_s8 + $0x2c0] sm:$0xff] }
  0xb6   : > { %587 = vmatprep.mubr.f32.mxu0 %v249_v40  ;;  %827 = vmatprep.mubr.f32.mxu1 %v393_v41  ;;  %v286_v39 = vld [vmem:[%s2421_s8 + $0x280] sm:$0xff]  ;;  %v293_v40 = vld [vmem:[%s2421_s8 + $0x2b8] sm:$0xff] }
  0xb7   : > { %1908 = vmatprep.subr.mxu1 %v431_v42  ;;  %v289_v41 = vld [vmem:[%s2421_s8 + $0x298] sm:$0xff] }
  0xb8   : > { %1909 = vmatpush3.msra.mxu1 %v431_v42  ;;  %v297_v42 = vld [vmem:[%s2421_s8 + $0x2d8] sm:$0xff] }
  0xb9   : > { %588 = vmatmul.mubr.f32.gmra.mxu0 %v248_v43  ;;  %828 = vmatmul.mubr.f32.gmra.mxu1 %v392_v44  ;;  %v292_v43 = vld [vmem:[%s2421_s8 + $0x2b0] sm:$0xff] }
  0xba   : > { %592 = vmatprep.mubr.f32.mxu0 %v252_v45  ;;  %832 = vmatprep.mubr.f32.mxu1 %v396_v46  ;;  %v296_v44 = vld [vmem:[%s2421_s8 + $0x2d0] sm:$0xff]  ;;  %v295_v45 = vld [vmem:[%s2421_s8 + $0x2c8] sm:$0xff] }
  0xbb   : > { %1910 = vmatprep.subr.mxu1 %v430_v47  ;;  %v300_v46 = vld [vmem:[%s2421_s8 + $0x2f0] sm:$0xff] }
  0xbc   : > { %1911 = vmatpush3.msra.mxu1 %v430_v47  ;;  %v298_v47 = vld [vmem:[%s2421_s8 + $0x2e0] sm:$0xff] }
  0xbd   : > { %593 = vmatmul.mubr.f32.gmra.mxu0 %v251_v48  ;;  %833 = vmatmul.mubr.f32.gmra.mxu1 %v395_v49  ;;  %v299_v48 = vld [vmem:[%s2421_s8 + $0x2e8] sm:$0xff]  ;;  %v301_v49 = vld [vmem:[%s2421_s8 + $0x2f8] sm:$0xff] }
  0xbe   : > { %597 = vmatprep.mubr.f32.mxu0 %v255_v50  ;;  %1912 = vmatprep.mubr.f32.mxu1 %v208_v51  ;;  %v303_v50 = vld [vmem:[%s2421_s8 + $0x308] sm:$0xff]  ;;  %v304_v51 = vld [vmem:[%s2421_s8 + $0x310] sm:$0xff] }
  0xc1   : > { %598 = vmatmul.mubr.f32.gmra.mxu0 %v254_v52  ;;  %1913 = vmatmul.mubr.f32.vlgmr.msra.gmra.mxu1 %v211_v53  ;;  %v302_v52 = vld [vmem:[%s2421_s8 + $0x300] sm:$0xff]  ;;  %v307_v53 = vld [vmem:[%s2421_s8 + $0x328] sm:$0xff] }
  0xc2   : > { %602 = vmatprep.mubr.f32.mxu0 %v258_v54  ;;  %1915 = vmatprep.mubr.f32.mxu1 %v214_v55  ;;  %v306_v54 = vld [vmem:[%s2421_s8 + $0x320] sm:$0xff] }
  0xc3   : > { %v310_v55 = vld [vmem:[%s2421_s8 + $0x340] sm:$0xff] }
  0xc5   : > { %603 = vmatmul.mubr.f32.gmra.mxu0 %v257_v56  ;;  %1916 = vmatmul.mubr.f32.gmra.mxu1 %v217_v57  ;;  %v305_v56 = vld [vmem:[%s2421_s8 + $0x318] sm:$0xff] }
  0xc6   : > { %607 = vmatprep.mubr.f32.mxu0 %v261_v58  ;;  %1918 = vmatprep.mubr.f32.mxu1 %v220_v59  ;;  %v313_v57 = vld [vmem:[%s2421_s8 + $0x358] sm:$0xff]  ;;  %v316_v59 = vld [vmem:[%s2421_s8 + $0x370] sm:$0xff] }
  0xc7   : > { %v309_v58 = vld [vmem:[%s2421_s8 + $0x338] sm:$0xff] }
  0xc9   : > { %608 = vmatmul.mubr.f32.gmra.mxu0 %v260_v60  ;;  %1919 = vmatmul.mubr.f32.gmra.mxu1 %v223_v61  ;;  %v308_v60 = vld [vmem:[%s2421_s8 + $0x330] sm:$0xff]  ;;  %v319_v61 = vld [vmem:[%s2421_s8 + $0x388] sm:$0xff] }
  0xca   : > { %612 = vmatprep.mubr.f32.mxu0 %v264_v62  ;;  %1921 = vmatprep.mubr.f32.mxu1 %v226_v63  ;;  %v312_v62 = vld [vmem:[%s2421_s8 + $0x350] sm:$0xff]  ;;  %v322_v63 = vld [vmem:[%s2421_s8 + $0x3a0] sm:$0xff] }
  0xcd   : > { %613 = vmatmul.mubr.f32.gmra.mxu0 %v263_v0  ;;  %1922 = vmatmul.mubr.f32.gmra.mxu1 %v229_v1  ;;  %v311_v0 = vld [vmem:[%s2421_s8 + $0x348] sm:$0xff]  ;;  %v325_v1 = vld [vmem:[%s2421_s8 + $0x3b8] sm:$0xff] }
  0xce   : > { %617 = vmatprep.mubr.f32.mxu0 %v267_v2  ;;  %1924 = vmatprep.mubr.f32.mxu1 %v232_v3  ;;  %v315_v2 = vld [vmem:[%s2421_s8 + $0x368] sm:$0xff]  ;;  %v328_v3 = vld [vmem:[%s2421_s8 + $0x3d0] sm:$0xff] }
  0xd1   : > { %618 = vmatmul.mubr.f32.gmra.mxu0 %v266_v4  ;;  %1925 = vmatmul.mubr.f32.gmra.mxu1 %v235_v5  ;;  %v314_v4 = vld [vmem:[%s2421_s8 + $0x360] sm:$0xff]  ;;  %v331_v5 = vld [vmem:[%s2421_s8 + $0x3e8] sm:$0xff] }
  0xd2   : > { %622 = vmatprep.mubr.f32.mxu0 %v270_v6  ;;  %1927 = vmatprep.mubr.f32.mxu1 %v238_v7  ;;  %v318_v6 = vld [vmem:[%s2421_s8 + $0x380] sm:$0xff] }
  0xd3   : > { %v334_v7 = vld [vmem:[%s2421_s8 + $0x400] sm:$0xff] }
  0xd5   : > { %623 = vmatmul.mubr.f32.gmra.mxu0 %v269_v8  ;;  %1928 = vmatmul.mubr.f32.gmra.mxu1 %v241_v9  ;;  %v317_v8 = vld [vmem:[%s2421_s8 + $0x378] sm:$0xff] }
  0xd6   : > { %627 = vmatprep.mubr.f32.mxu0 %v273_v10  ;;  %1930 = vmatprep.mubr.f32.mxu1 %v244_v11  ;;  %v337_v9 = vld [vmem:[%s2421_s8 + $0x418] sm:$0xff]  ;;  %v340_v11 = vld [vmem:[%s2421_s8 + $0x430] sm:$0xff] }
  0xd7   : > { %v321_v10 = vld [vmem:[%s2421_s8 + $0x398] sm:$0xff] }
  0xd9   : > { %628 = vmatmul.mubr.f32.gmra.mxu0 %v272_v12  ;;  %1931 = vmatmul.mubr.f32.gmra.mxu1 %v247_v13  ;;  %v320_v12 = vld [vmem:[%s2421_s8 + $0x390] sm:$0xff]  ;;  %v343_v13 = vld [vmem:[%s2421_s8 + $0x448] sm:$0xff] }
  0xda   : > { %632 = vmatprep.mubr.f32.mxu0 %v276_v14  ;;  %1933 = vmatprep.mubr.f32.mxu1 %v250_v15  ;;  %v324_v14 = vld [vmem:[%s2421_s8 + $0x3b0] sm:$0xff]  ;;  %v346_v15 = vld [vmem:[%s2421_s8 + $0x460] sm:$0xff] }
  0xdd   : > { %633 = vmatmul.mubr.f32.gmra.mxu0 %v275_v16  ;;  %1934 = vmatmul.mubr.f32.gmra.mxu1 %v253_v17  ;;  %v323_v16 = vld [vmem:[%s2421_s8 + $0x3a8] sm:$0xff]  ;;  %v349_v17 = vld [vmem:[%s2421_s8 + $0x478] sm:$0xff] }
  0xde   : > { %637 = vmatprep.mubr.f32.mxu0 %v279_v18  ;;  %1936 = vmatprep.mubr.f32.mxu1 %v256_v19  ;;  %v327_v18 = vld [vmem:[%s2421_s8 + $0x3c8] sm:$0xff]  ;;  %v352_v19 = vld [vmem:[%s2421_s8 + $0x490] sm:$0xff] }
  0xe1   : > { %638 = vmatmul.mubr.f32.gmra.mxu0 %v278_v20  ;;  %1937 = vmatmul.mubr.f32.gmra.mxu1 %v259_v21  ;;  %v326_v20 = vld [vmem:[%s2421_s8 + $0x3c0] sm:$0xff]  ;;  %v355_v21 = vld [vmem:[%s2421_s8 + $0x4a8] sm:$0xff] }
  0xe2   : > { %642 = vmatprep.mubr.f32.mxu0 %v282_v22  ;;  %1939 = vmatprep.mubr.f32.mxu1 %v262_v23  ;;  %v330_v22 = vld [vmem:[%s2421_s8 + $0x3e0] sm:$0xff] }
  0xe3   : > { %v358_v23 = vld [vmem:[%s2421_s8 + $0x4c0] sm:$0xff] }
  0xe5   : > { %643 = vmatmul.mubr.f32.gmra.mxu0 %v281_v24  ;;  %1940 = vmatmul.mubr.f32.gmra.mxu1 %v265_v25  ;;  %v329_v24 = vld [vmem:[%s2421_s8 + $0x3d8] sm:$0xff] }
  0xe6   : > { %647 = vmatprep.mubr.f32.mxu0 %v285_v26  ;;  %1942 = vmatprep.mubr.f32.mxu1 %v268_v27  ;;  %v361_v25 = vld [vmem:[%s2421_s8 + $0x4d8] sm:$0xff]  ;;  %v364_v27 = vld [vmem:[%s2421_s8 + $0x4f0] sm:$0xff] }
  0xe7   : > { %v333_v26 = vld [vmem:[%s2421_s8 + $0x3f8] sm:$0xff] }
  0xe9   : > { %648 = vmatmul.mubr.f32.gmra.mxu0 %v284_v28  ;;  %1943 = vmatmul.mubr.f32.gmra.mxu1 %v271_v29  ;;  %v332_v28 = vld [vmem:[%s2421_s8 + $0x3f0] sm:$0xff]  ;;  %v367_v29 = vld [vmem:[%s2421_s8 + $0x508] sm:$0xff] }
  0xea   : > { %652 = vmatprep.mubr.f32.mxu0 %v288_v30  ;;  %1945 = vmatprep.mubr.f32.mxu1 %v274_v31  ;;  %v336_v30 = vld [vmem:[%s2421_s8 + $0x410] sm:$0xff]  ;;  %v370_v31 = vld [vmem:[%s2421_s8 + $0x520] sm:$0xff] }
  0xed   : > { %653 = vmatmul.mubr.f32.gmra.mxu0 %v287_v32  ;;  %1946 = vmatmul.mubr.f32.gmra.mxu1 %v277_v33  ;;  %v335_v32 = vld [vmem:[%s2421_s8 + $0x408] sm:$0xff]  ;;  %v373_v33 = vld [vmem:[%s2421_s8 + $0x538] sm:$0xff] }
  0xee   : > { %657 = vmatprep.mubr.f32.mxu0 %v291_v34  ;;  %1948 = vmatprep.mubr.f32.mxu1 %v280_v35  ;;  %v339_v34 = vld [vmem:[%s2421_s8 + $0x428] sm:$0xff]  ;;  %v376_v35 = vld [vmem:[%s2421_s8 + $0x550] sm:$0xff] }
  0xf1   : > { %658 = vmatmul.mubr.f32.gmra.mxu0 %v290_v36  ;;  %1949 = vmatmul.mubr.f32.gmra.mxu1 %v283_v37  ;;  %v338_v36 = vld [vmem:[%s2421_s8 + $0x420] sm:$0xff]  ;;  %v379_v37 = vld [vmem:[%s2421_s8 + $0x568] sm:$0xff] }
  0xf2   : > { %662 = vmatprep.mubr.f32.mxu0 %v294_v38  ;;  %1951 = vmatprep.mubr.f32.mxu1 %v286_v39  ;;  %v342_v38 = vld [vmem:[%s2421_s8 + $0x440] sm:$0xff] }
  0xf3   : > { %v382_v39 = vld [vmem:[%s2421_s8 + $0x580] sm:$0xff] }
  0xf5   : > { %663 = vmatmul.mubr.f32.gmra.mxu0 %v293_v40  ;;  %1952 = vmatmul.mubr.f32.gmra.mxu1 %v289_v41  ;;  %v341_v40 = vld [vmem:[%s2421_s8 + $0x438] sm:$0xff] }
  0xf6   : > { %667 = vmatprep.mubr.f32.mxu0 %v297_v42  ;;  %1954 = vmatprep.mubr.f32.mxu1 %v292_v43  ;;  %v385_v41 = vld [vmem:[%s2421_s8 + $0x598] sm:$0xff]  ;;  %v388_v43 = vld [vmem:[%s2421_s8 + $0x5b0] sm:$0xff] }
  0xf7   : > { %v345_v42 = vld [vmem:[%s2421_s8 + $0x458] sm:$0xff] }
  0xf9   : > { %668 = vmatmul.mubr.f32.gmra.mxu0 %v296_v44  ;;  %1955 = vmatmul.mubr.f32.gmra.mxu1 %v295_v45  ;;  %v344_v44 = vld [vmem:[%s2421_s8 + $0x450] sm:$0xff]  ;;  %v391_v45 = vld [vmem:[%s2421_s8 + $0x5c8] sm:$0xff] }
  0xfa   : > { %672 = vmatprep.mubr.f32.mxu0 %v300_v46  ;;  %1957 = vmatprep.mubr.f32.mxu1 %v298_v47  ;;  %v348_v46 = vld [vmem:[%s2421_s8 + $0x470] sm:$0xff]  ;;  %v394_v47 = vld [vmem:[%s2421_s8 + $0x5e0] sm:$0xff] }
  0xfd   : > { %673 = vmatmul.mubr.f32.gmra.mxu0 %v299_v48  ;;  %1958 = vmatmul.mubr.f32.gmra.mxu1 %v301_v49  ;;  %v347_v48 = vld [vmem:[%s2421_s8 + $0x468] sm:$0xff]  ;;  %v397_v49 = vld [vmem:[%s2421_s8 + $0x5f8] sm:$0xff]  ;;  %s1778_s8 = sshll.u32 %s2417_s4, 9  ;;  %s1781_s4 = sshll.u32 (%p2368_p8), %s2347_s2, 6 }
  0xfe   : > { %677 = vmatprep.mubr.f32.mxu0 %v303_v50  ;;  %1960 = vmatprep.mubr.f32.mxu1 %v304_v51  ;;  %s2896_s27 = scalar_lea.vmem [#allocation5], %s1778_s8   ;;  %s1296_s5 = ssub.s32 (%p2368_p8), 125, %s1781_s4 }
  0xff   : > { %p1297_p7 = scmp.lt.s32.totalorder (%p2368_p8), %s1296_s5, 64 }
 0x101   : > { %678 = vmatmul.mubr.f32.gmra.mxu0 %v302_v52  ;;  %1961 = vmatmul.mubr.f32.gmra.mxu1 %v307_v53 }
 0x102   : > { %682 = vmatprep.mubr.f32.mxu0 %v306_v54  ;;  %1963 = vmatprep.mubr.f32.mxu1 %v310_v55 }
 0x105   : > { %683 = vmatmul.mubr.f32.gmra.mxu0 %v305_v56  ;;  %1964 = vmatmul.mubr.f32.gmra.mxu1 %v313_v57 }
 0x106   : > { %687 = vmatprep.mubr.f32.mxu0 %v309_v58  ;;  %1966 = vmatprep.mubr.f32.mxu1 %v316_v59 }
 0x109   : > { %688 = vmatmul.mubr.f32.gmra.mxu0 %v308_v60  ;;  %1967 = vmatmul.mubr.f32.gmra.mxu1 %v319_v61 }
 0x10a   : > { %692 = vmatprep.mubr.f32.mxu0 %v312_v62  ;;  %1969 = vmatprep.mubr.f32.mxu1 %v322_v63 }
 0x10d   : > { %693 = vmatmul.mubr.f32.gmra.mxu0 %v311_v0  ;;  %1970 = vmatmul.mubr.f32.gmra.mxu1 %v325_v1 }
 0x10e   : > { %697 = vmatprep.mubr.f32.mxu0 %v315_v2  ;;  %1972 = vmatprep.mubr.f32.mxu1 %v328_v3 }
 0x111   : > { %698 = vmatmul.mubr.f32.gmra.mxu0 %v314_v4  ;;  %1973 = vmatmul.mubr.f32.gmra.mxu1 %v331_v5 }
 0x112   : > { %702 = vmatprep.mubr.f32.mxu0 %v318_v6  ;;  %1975 = vmatprep.mubr.f32.mxu1 %v334_v7 }
 0x115   : > { %703 = vmatmul.mubr.f32.gmra.mxu0 %v317_v8  ;;  %1976 = vmatmul.mubr.f32.gmra.mxu1 %v337_v9 }
 0x116   : > { %707 = vmatprep.mubr.f32.mxu0 %v321_v10  ;;  %1978 = vmatprep.mubr.f32.mxu1 %v340_v11 }
 0x119   : > { %708 = vmatmul.mubr.f32.gmra.mxu0 %v320_v12  ;;  %1979 = vmatmul.mubr.f32.gmra.mxu1 %v343_v13 }
 0x11a   : > { %712 = vmatprep.mubr.f32.mxu0 %v324_v14  ;;  %1981 = vmatprep.mubr.f32.mxu1 %v346_v15 }
 0x11d   : > { %713 = vmatmul.mubr.f32.gmra.mxu0 %v323_v16  ;;  %1982 = vmatmul.mubr.f32.gmra.mxu1 %v349_v17 }
 0x11e   : > { %717 = vmatprep.mubr.f32.mxu0 %v327_v18  ;;  %1984 = vmatprep.mubr.f32.mxu1 %v352_v19 }
 0x121   : > { %718 = vmatmul.mubr.f32.gmra.mxu0 %v326_v20  ;;  %1985 = vmatmul.mubr.f32.gmra.mxu1 %v355_v21 }
 0x122   : > { %722 = vmatprep.mubr.f32.mxu0 %v330_v22  ;;  %1987 = vmatprep.mubr.f32.mxu1 %v358_v23 }
 0x125   : > { %723 = vmatmul.mubr.f32.gmra.mxu0 %v329_v24  ;;  %1988 = vmatmul.mubr.f32.gmra.mxu1 %v361_v25 }
 0x126   : > { %727 = vmatprep.mubr.f32.mxu0 %v333_v26  ;;  %1990 = vmatprep.mubr.f32.mxu1 %v364_v27 }
 0x129   : > { %728 = vmatmul.mubr.f32.gmra.mxu0 %v332_v28  ;;  %1991 = vmatmul.mubr.f32.gmra.mxu1 %v367_v29 }
 0x12a   : > { %732 = vmatprep.mubr.f32.mxu0 %v336_v30  ;;  %1993 = vmatprep.mubr.f32.mxu1 %v370_v31 }
 0x12d   : > { %733 = vmatmul.mubr.f32.gmra.mxu0 %v335_v32  ;;  %1994 = vmatmul.mubr.f32.gmra.mxu1 %v373_v33 }
 0x12e   : > { %737 = vmatprep.mubr.f32.mxu0 %v339_v34  ;;  %1996 = vmatprep.mubr.f32.mxu1 %v376_v35 }
 0x131   : > { %738 = vmatmul.mubr.f32.gmra.mxu0 %v338_v36  ;;  %1997 = vmatmul.mubr.f32.gmra.mxu1 %v379_v37 }
 0x132   : > { %742 = vmatprep.mubr.f32.mxu0 %v342_v38  ;;  %1999 = vmatprep.mubr.f32.mxu1 %v382_v39 }
 0x135   : > { %743 = vmatmul.mubr.f32.gmra.mxu0 %v341_v40  ;;  %2000 = vmatmul.mubr.f32.gmra.mxu1 %v385_v41 }
 0x136   : > { %747 = vmatprep.mubr.f32.mxu0 %v345_v42  ;;  %2002 = vmatprep.mubr.f32.mxu1 %v388_v43 }
 0x139   : > { %748 = vmatmul.mubr.f32.gmra.mxu0 %v344_v44  ;;  %2003 = vmatmul.mubr.f32.gmra.mxu1 %v391_v45 }
 0x13a   : > { %752 = vmatprep.mubr.f32.mxu0 %v348_v46  ;;  %2005 = vmatprep.mubr.f32.mxu1 %v394_v47 }
 0x13d   : > { %753 = vmatmul.mubr.f32.gmra.mxu0 %v347_v48  ;;  %2006 = vmatmul.mubr.f32.gmra.mxu1 %v397_v49  ;;  %v2888_v48 = vld [vmem:[#allocation2] ss:$0 sm:$0xff] }
 0x141   : > { %v2827_v50 = vpop.f32.mrf.mxu0  ;;  %v2829_v51 = vpop.f32.mrf.mxu1 }
 0x143   : > { %v521_v52 = vpop.f32.mrf.mxu0  ;;  %v761_v53 = vpop.f32.mrf.mxu1 }
 0x145   : > { %v524_v54 = vpop.f32.mrf.mxu0  ;;  %v2831_v55 = vpop.f32.mrf.mxu1 }
 0x146   : > { %v525_v53 = vadd.f32 %v2888_v48, %v524_v54 }
 0x147   : > { %v526_v56 = vpop.f32.mrf.mxu0  ;;  %v766_v57 = vpop.f32.mrf.mxu1 }
 0x149   : > { %v2833_v58 = vpop.f32.mrf.mxu0  ;;  %v2835_v59 = vpop.f32.mrf.mxu1 }
 0x14b   : > { %v531_v60 = vpop.f32.mrf.mxu0  ;;  %v771_v61 = vpop.f32.mrf.mxu1 }
 0x14c   : > { %v520_v60 = vadd.f32 %v2888_v48, %v2827_v50  ;;  %v530_v50 = vadd.f32 %v2888_v48, %v2833_v58 }
 0x14d   : > { %v534_v62 = vpop.f32.mrf.mxu0  ;;  %v2837_v63 = vpop.f32.mrf.mxu1 }
 0x14f   : > { %v536_v0 = vpop.f32.mrf.mxu0  ;;  %v776_v1 = vpop.f32.mrf.mxu1 }
 0x151   : > { %v2839_v2 = vpop.f32.mrf.mxu0  ;;  %v2841_v3 = vpop.f32.mrf.mxu1 }
 0x153   : > { %v541_v4 = vpop.f32.mrf.mxu0  ;;  %v781_v5 = vpop.f32.mrf.mxu1 }
 0x154   : > { %v535_v4 = vadd.f32 %v2888_v48, %v534_v62 }
 0x155   : > { %v2843_v6 = vpop.f32.mrf.mxu0  ;;  %v2845_v7 = vpop.f32.mrf.mxu1 }
 0x157   : > { %v546_v8 = vpop.f32.mrf.mxu0  ;;  %v786_v9 = vpop.f32.mrf.mxu1 }
 0x159   : > { %v2847_v10 = vpop.f32.mrf.mxu0  ;;  %v2849_v11 = vpop.f32.mrf.mxu1 }
 0x15b   : > { %v551_v12 = vpop.f32.mrf.mxu0  ;;  %v791_v13 = vpop.f32.mrf.mxu1 }
 0x15c   : > { %v545_v13 = vadd.f32 %v2888_v48, %v2843_v6 }
 0x15d   : > { %v2851_v14 = vpop.f32.mrf.mxu0  ;;  %v2853_v15 = vpop.f32.mrf.mxu1 }
 0x15f   : > { %v556_v16 = vpop.f32.mrf.mxu0  ;;  %v796_v17 = vpop.f32.mrf.mxu1 }
 0x161   : > { %v2855_v18 = vpop.f32.mrf.mxu0  ;;  %v2857_v19 = vpop.f32.mrf.mxu1 }
 0x163   : > { %v561_v20 = vpop.f32.mrf.mxu0  ;;  %v801_v21 = vpop.f32.mrf.mxu1 }
 0x164   : > { %v540_v21 = vadd.f32 %v2888_v48, %v2839_v2 }
 0x165   : > { %v2859_v22 = vpop.f32.mrf.mxu0  ;;  %v2861_v23 = vpop.f32.mrf.mxu1 }
 0x167   : > { %v566_v24 = vpop.f32.mrf.mxu0  ;;  %v806_v25 = vpop.f32.mrf.mxu1 }
 0x169   : > { %v2863_v26 = vpop.f32.mrf.mxu0  ;;  %v2865_v27 = vpop.f32.mrf.mxu1 }
 0x16b   : > { %v571_v28 = vpop.f32.mrf.mxu0  ;;  %v811_v29 = vpop.f32.mrf.mxu1 }
 0x16c   : > { %v555_v28 = vadd.f32 %v2888_v48, %v2851_v14 }
 0x16d   : > { %v2867_v30 = vpop.f32.mrf.mxu0  ;;  %v2869_v31 = vpop.f32.mrf.mxu1 }
 0x16f   : > { %v576_v32 = vpop.f32.mrf.mxu0  ;;  %v816_v33 = vpop.f32.mrf.mxu1 }
 0x170   : > { %v550_v33 = vadd.f32 %v2888_v48, %v2847_v10 }
 0x171   : > { %v2871_v34 = vpop.f32.mrf.mxu0  ;;  %v2873_v35 = vpop.f32.mrf.mxu1 }
 0x173   : > { %v581_v36 = vpop.f32.mrf.mxu0  ;;  %v821_v37 = vpop.f32.mrf.mxu1 }
 0x175   : > { %v2875_v38 = vpop.f32.mrf.mxu0  ;;  %v2877_v39 = vpop.f32.mrf.mxu1 }
 0x177   : > { %v586_v40 = vpop.f32.mrf.mxu0  ;;  %v826_v41 = vpop.f32.mrf.mxu1 }
 0x178   : > { %v565_v40 = vadd.f32 %v2888_v48, %v2859_v22 }
 0x179   : > { %v2879_v42 = vpop.f32.mrf.mxu0  ;;  %v2881_v43 = vpop.f32.mrf.mxu1 }
 0x17b   : > { %v591_v44 = vpop.f32.mrf.mxu0  ;;  %v831_v45 = vpop.f32.mrf.mxu1 }
 0x17c   : > { %v560_v45 = vadd.f32 %v2888_v48, %v2855_v18 }
 0x17d   : > { %v2883_v46 = vpop.f32.mrf.mxu0  ;;  %v2885_v47 = vpop.f32.mrf.mxu1 }
 0x17f   : > { %v596_v49 = vpop.f32.mrf.mxu0  ;;  %v836_v52 = vpop.f32.mrf.mxu1 }
 0x181   : > { %v2891_v56 = vpop.f32.mrf.mxu0  ;;  %v1914_v57 = vpop.f32.mrf.mxu1 }
 0x182   : > { %v910_v61 = vadd.f32 %v1914_v57, %v525_v53  ;;  %v575_v53 = vadd.f32 %v2888_v48, %v2867_v30 }
 0x183   : > { %v601_v0 = vpop.f32.mrf.mxu0  ;;  %v904_v1 = vpop.f32.mrf.mxu1 }
 0x184   : > { %1225 = vst.msk [vmem:[%s2896_s27 + $0x8] sm:$0xff] %vm1223_vm0, %v910_v61  ;;  %v905_v54 = vadd.f32 %v904_v1, %v520_v60  ;;  %v570_v61 = vadd.f32 %v2888_v48, %v2863_v26 }
 0x185   : > { %v2900_v5 = vpop.f32.mrf.mxu0  ;;  %v1917_v8 = vpop.f32.mrf.mxu1 }
 0x186   : > { %1224 = vst.msk [vmem:[%s2896_s27] sm:$0xff] %vm1223_vm0, %v905_v54  ;;  %v920_v9 = vadd.f32 %v1917_v8, %v535_v4  ;;  %v585_v4 = vadd.f32 %v2888_v48, %v2875_v38 }
 0x187   : > { %v606_v62 = vpop.f32.mrf.mxu0  ;;  %v914_v12 = vpop.f32.mrf.mxu1 }
 0x188   : > { %1227 = vst.msk [vmem:[%s2896_s27 + $0x18] sm:$0xff] %vm1223_vm0, %v920_v9  ;;  %v915_v16 = vadd.f32 %v914_v12, %v530_v50  ;;  %v580_v50 = vadd.f32 %v2888_v48, %v2871_v34  ;;  %v595_v12 = vadd.f32 %v2888_v48, %v2883_v46 }
 0x189   : > { %v2910_v17 = vpop.f32.mrf.mxu0  ;;  %v1920_v20 = vpop.f32.mrf.mxu1 }
 0x18a   : > { %1226 = vst.msk [vmem:[%s2896_s27 + $0x10] sm:$0xff] %vm1223_vm0, %v915_v16  ;;  %v930_v58 = vadd.f32 %v1920_v20, %v545_v13  ;;  %v590_v20 = vadd.f32 %v2888_v48, %v2879_v42 }
 0x18b   : > { %v611_v24 = vpop.f32.mrf.mxu0  ;;  %v924_v25 = vpop.f32.mrf.mxu1 }
 0x18c   : > { %1229 = vst.msk [vmem:[%s2896_s27 + $0x28] sm:$0xff] %vm1223_vm0, %v930_v58  ;;  %v925_v6 = vadd.f32 %v924_v25, %v540_v21  ;;  %v605_v24 = vadd.f32 %v2888_v48, %v2900_v5 }
 0x18d   : > { %v614_v29 = vpop.f32.mrf.mxu0  ;;  %v1923_v32 = vpop.f32.mrf.mxu1 }
 0x18e   : > { %1228 = vst.msk [vmem:[%s2896_s27 + $0x20] sm:$0xff] %vm1223_vm0, %v925_v6  ;;  %v940_v2 = vadd.f32 %v1923_v32, %v555_v28  ;;  %v600_v6 = vadd.f32 %v2888_v48, %v2891_v56 }
 0x18f   : > { %v616_v36 = vpop.f32.mrf.mxu0  ;;  %v934_v37 = vpop.f32.mrf.mxu1 }
 0x190   : > { %1231 = vst.msk [vmem:[%s2896_s27 + $0x38] sm:$0xff] %vm1223_vm0, %v940_v2  ;;  %v935_v14 = vadd.f32 %v934_v37, %v550_v33  ;;  %v615_v2 = vadd.f32 %v2888_v48, %v614_v29 }
 0x191   : > { %v619_v41 = vpop.f32.mrf.mxu0  ;;  %v1926_v44 = vpop.f32.mrf.mxu1 }
 0x192   : > { %1230 = vst.msk [vmem:[%s2896_s27 + $0x30] sm:$0xff] %vm1223_vm0, %v935_v14  ;;  %v950_v10 = vadd.f32 %v1926_v44, %v565_v40  ;;  %v610_v40 = vadd.f32 %v2888_v48, %v2910_v17 }
 0x193   : > { %v621_v49 = vpop.f32.mrf.mxu0  ;;  %v944_v52 = vpop.f32.mrf.mxu1 }
 0x194   : > { %1233 = vst.msk [vmem:[%s2896_s27 + $0x48] sm:$0xff] %vm1223_vm0, %v950_v10  ;;  %v945_v22 = vadd.f32 %v944_v52, %v560_v45  ;;  %v620_v52 = vadd.f32 %v2888_v48, %v619_v41 }
 0x195   : > { %v624_v57 = vpop.f32.mrf.mxu0  ;;  %v1929_v60 = vpop.f32.mrf.mxu1 }
 0x196   : > { %1232 = vst.msk [vmem:[%s2896_s27 + $0x40] sm:$0xff] %vm1223_vm0, %v945_v22  ;;  %v960_v18 = vadd.f32 %v1929_v60, %v575_v53  ;;  %v625_v45 = vadd.f32 %v2888_v48, %v624_v57 }
 0x197   : > { %v626_v0 = vpop.f32.mrf.mxu0  ;;  %v954_v1 = vpop.f32.mrf.mxu1 }
 0x198   : > { %1235 = vst.msk [vmem:[%s2896_s27 + $0x58] sm:$0xff] %vm1223_vm0, %v960_v18  ;;  %v955_v30 = vadd.f32 %v954_v1, %v570_v61 }
 0x199   : > { %v629_v54 = vpop.f32.mrf.mxu0  ;;  %v1932_v8 = vpop.f32.mrf.mxu1 }
 0x19a   : > { %1234 = vst.msk [vmem:[%s2896_s27 + $0x50] sm:$0xff] %vm1223_vm0, %v955_v30  ;;  %v970_v26 = vadd.f32 %v1932_v8, %v585_v4  ;;  %v630_v0 = vadd.f32 %v2888_v48, %v629_v54 }
 0x19b   : > { %v631_v9 = vpop.f32.mrf.mxu0  ;;  %v964_v62 = vpop.f32.mrf.mxu1 }
 0x19c   : > { %1237 = vst.msk [vmem:[%s2896_s27 + $0x68] sm:$0xff] %vm1223_vm0, %v970_v26  ;;  %v965_v38 = vadd.f32 %v964_v62, %v580_v50 }
 0x19d   : > { %v634_v13 = vpop.f32.mrf.mxu0  ;;  %v1935_v16 = vpop.f32.mrf.mxu1 }
 0x19e   : > { %1236 = vst.msk [vmem:[%s2896_s27 + $0x60] sm:$0xff] %vm1223_vm0, %v965_v38  ;;  %v980_v34 = vadd.f32 %v1935_v16, %v595_v12  ;;  %v635_v60 = vadd.f32 %v2888_v48, %v634_v13 }
 0x19f   : > { %v636_v21 = vpop.f32.mrf.mxu0  ;;  %v974_v58 = vpop.f32.mrf.mxu1 }
 0x1a0   : > { %1239 = vst.msk [vmem:[%s2896_s27 + $0x78] sm:$0xff] %vm1223_vm0, %v980_v34  ;;  %v975_v46 = vadd.f32 %v974_v58, %v590_v20 }
 0x1a1   : > { %v639_v25 = vpop.f32.mrf.mxu0  ;;  %v1938_v28 = vpop.f32.mrf.mxu1 }
 0x1a2   : > { %1238 = vst.msk [vmem:[%s2896_s27 + $0x70] sm:$0xff] %vm1223_vm0, %v975_v46  ;;  %v990_v42 = vadd.f32 %v1938_v28, %v605_v24  ;;  %v640_v9 = vadd.f32 %v2888_v48, %v639_v25 }
 0x1a3   : > { %v641_v32 = vpop.f32.mrf.mxu0  ;;  %v984_v33 = vpop.f32.mrf.mxu1 }
 0x1a4   : > { %1241 = vst.msk [vmem:[%s2896_s27 + $0x88] sm:$0xff] %vm1223_vm0, %v990_v42  ;;  %v985_v5 = vadd.f32 %v984_v33, %v600_v6 }
 0x1a5   : > { %v644_v36 = vpop.f32.mrf.mxu0  ;;  %v1941_v37 = vpop.f32.mrf.mxu1 }
 0x1a6   : > { %1240 = vst.msk [vmem:[%s2896_s27 + $0x80] sm:$0xff] %vm1223_vm0, %v985_v5  ;;  %v1000_v56 = vadd.f32 %v1941_v37, %v615_v2  ;;  %v645_v30 = vadd.f32 %v2888_v48, %v644_v36 }
 0x1a7   : > { %v646_v14 = vpop.f32.mrf.mxu0  ;;  %v994_v44 = vpop.f32.mrf.mxu1 }
 0x1a8   : > { %1243 = vst.msk [vmem:[%s2896_s27 + $0x98] sm:$0xff] %vm1223_vm0, %v1000_v56  ;;  %v995_v29 = vadd.f32 %v994_v44, %v610_v40 }
 0x1a9   : > { %v649_v10 = vpop.f32.mrf.mxu0  ;;  %v1944_v49 = vpop.f32.mrf.mxu1 }
 0x1aa   : > { %1242 = vst.msk [vmem:[%s2896_s27 + $0x90] sm:$0xff] %vm1223_vm0, %v995_v29  ;;  %v1010_v17 = vadd.f32 %v1944_v49, %v625_v45  ;;  %v650_v34 = vadd.f32 %v2888_v48, %v649_v10 }
 0x1ab   : > { %v651_v53 = vpop.f32.mrf.mxu0  ;;  %v1004_v22 = vpop.f32.mrf.mxu1 }
 0x1ac   : > { %1245 = vst.msk [vmem:[%s2896_s27 + $0xa8] sm:$0xff] %vm1223_vm0, %v1010_v17  ;;  %v1005_v57 = vadd.f32 %v1004_v22, %v620_v52 }
 0x1ad   : > { %v654_v61 = vpop.f32.mrf.mxu0  ;;  %v1947_v18 = vpop.f32.mrf.mxu1 }
 0x1ae   : > { %1244 = vst.msk [vmem:[%s2896_s27 + $0xa0] sm:$0xff] %vm1223_vm0, %v1005_v57  ;;  %v1020_v41 = vadd.f32 %v1947_v18, %v635_v60  ;;  %v655_v38 = vadd.f32 %v2888_v48, %v654_v61 }
 0x1af   : > { %v656_v1 = vpop.f32.mrf.mxu0  ;;  %v1014_v4 = vpop.f32.mrf.mxu1 }
 0x1b0   : > { %1247 = vst.msk [vmem:[%s2896_s27 + $0xb8] sm:$0xff] %vm1223_vm0, %v1020_v41  ;;  %v1015_v8 = vadd.f32 %v1014_v4, %v630_v0 }
 0x1b1   : > { %v659_v50 = vpop.f32.mrf.mxu0  ;;  %v1950_v26 = vpop.f32.mrf.mxu1 }
 0x1b2   : > { %1246 = vst.msk [vmem:[%s2896_s27 + $0xb0] sm:$0xff] %vm1223_vm0, %v1015_v8  ;;  %v1030_v54 = vadd.f32 %v1950_v26, %v645_v30  ;;  %v660_v42 = vadd.f32 %v2888_v48, %v659_v50 }
 0x1b3   : > { %v661_v62 = vpop.f32.mrf.mxu0  ;;  %v1024_v12 = vpop.f32.mrf.mxu1 }
 0x1b4   : > { %1249 = vst.msk [vmem:[%s2896_s27 + $0xc8] sm:$0xff] %vm1223_vm0, %v1030_v54  ;;  %v1025_v13 = vadd.f32 %v1024_v12, %v640_v9 }
 0x1b5   : > { %v664_v16 = vpop.f32.mrf.mxu0  ;;  %v1953_v20 = vpop.f32.mrf.mxu1 }
 0x1b6   : > { %1248 = vst.msk [vmem:[%s2896_s27 + $0xc0] sm:$0xff] %vm1223_vm0, %v1025_v13  ;;  %v1040_v21 = vadd.f32 %v1953_v20, %v655_v38  ;;  %v665_v46 = vadd.f32 %v2888_v48, %v664_v16 }
 0x1b7   : > { %v666_v58 = vpop.f32.mrf.mxu0  ;;  %v1034_v24 = vpop.f32.mrf.mxu1 }
 0x1b8   : > { %1251 = vst.msk [vmem:[%s2896_s27 + $0xd8] sm:$0xff] %vm1223_vm0, %v1040_v21  ;;  %v1035_v25 = vadd.f32 %v1034_v24, %v650_v34 }
 0x1b9   : > { %v669_v28 = vpop.f32.mrf.mxu0  ;;  %v1956_v6 = vpop.f32.mrf.mxu1 }
 0x1ba   : > { %1250 = vst.msk [vmem:[%s2896_s27 + $0xd0] sm:$0xff] %vm1223_vm0, %v1035_v25  ;;  %v1050_v32 = vadd.f32 %v1956_v6, %v665_v46  ;;  %v670_v40 = vadd.f32 %v2888_v48, %v669_v28 }
 0x1bb   : > { %v671_v33 = vpop.f32.mrf.mxu0  ;;  %v1044_v2 = vpop.f32.mrf.mxu1 }
 0x1bc   : > { %1253 = vst.msk [vmem:[%s2896_s27 + $0xe8] sm:$0xff] %vm1223_vm0, %v1050_v32  ;;  %v1045_v5 = vadd.f32 %v1044_v2, %v660_v42 }
 0x1bd   : > { %v674_v36 = vpop.f32.mrf.mxu0  ;;  %v1959_v37 = vpop.f32.mrf.mxu1 }
 0x1be   : > { %1252 = vst.msk [vmem:[%s2896_s27 + $0xe0] sm:$0xff] %vm1223_vm0, %v1045_v5  ;;  %v675_v56 = vadd.f32 %v2888_v48, %v674_v36 }
 0x1bf   : > { %v676_v14 = vpop.f32.mrf.mxu0  ;;  %v1054_v44 = vpop.f32.mrf.mxu1 }
 0x1c0   : > { %v1060_v45 = vadd.f32 %v1959_v37, %v675_v56  ;;  %v1055_v29 = vadd.f32 %v1054_v44, %v670_v40 }
 0x1c1   : > { %v679_v10 = vpop.f32.mrf.mxu0  ;;  %v1962_v49 = vpop.f32.mrf.mxu1 }
 0x1c2   : > { %1255 = vst.msk [vmem:[%s2896_s27 + $0xf8] sm:$0xff] %vm1223_vm0, %v1060_v45  ;;  %1254 = vst.msk [vmem:[%s2896_s27 + $0xf0] sm:$0xff] %vm1223_vm0, %v1055_v29  ;;  %v680_v52 = vadd.f32 %v2888_v48, %v679_v10  ;;  %v765_v10 = vadd.f32 %v2888_v48, %v2831_v55 }
 0x1c3   : > { %v681_v17 = vpop.f32.mrf.mxu0  ;;  %v1064_v53 = vpop.f32.mrf.mxu1 }
 0x1c4   : > { %v1065_v22 = vadd.f32 %v1064_v53, %v680_v52  ;;  %v760_v53 = vadd.f32 %v2888_v48, %v2829_v51  ;;  %v770_v51 = vadd.f32 %v2888_v48, %v2835_v59 }
 0x1c5   : > { %v684_v60 = vpop.f32.mrf.mxu0  ;;  %v1965_v57 = vpop.f32.mrf.mxu1 }
 0x1c6   : > { %1256 = vst.msk [vmem:[%s2896_s27 + $0x100] sm:$0xff] %vm1223_vm0, %v1065_v22  ;;  %v685_v61 = vadd.f32 %v2888_v48, %v684_v60 }
 0x1c7   : > { %v686_v18 = vpop.f32.mrf.mxu0  ;;  %v1074_v0 = vpop.f32.mrf.mxu1 }
 0x1c8   : > { %v1070_v41 = vadd.f32 %v1962_v49, %v685_v61  ;;  %v775_v18 = vadd.f32 %v2888_v48, %v2837_v63 }
 0x1c9   : > { %v689_v1 = vpop.f32.mrf.mxu0  ;;  %v1968_v4 = vpop.f32.mrf.mxu1 }
 0x1ca   : > { %1257 = vst.msk [vmem:[%s2896_s27 + $0x108] sm:$0xff] %vm1223_vm0, %v1070_v41  ;;  %v690_v30 = vadd.f32 %v2888_v48, %v689_v1 }
 0x1cb   : > { %v691_v8 = vpop.f32.mrf.mxu0  ;;  %v1084_v50 = vpop.f32.mrf.mxu1 }
 0x1cc   : > { %v1075_v26 = vadd.f32 %v1074_v0, %v690_v30 }
 0x1cd   : > { %v694_v9 = vpop.f32.mrf.mxu0  ;;  %v1971_v54 = vpop.f32.mrf.mxu1 }
 0x1ce   : > { %1258 = vst.msk [vmem:[%s2896_s27 + $0x110] sm:$0xff] %vm1223_vm0, %v1075_v26  ;;  %v695_v62 = vadd.f32 %v2888_v48, %v694_v9 }
 0x1cf   : > { %v696_v12 = vpop.f32.mrf.mxu0  ;;  %v1094_v38 = vpop.f32.mrf.mxu1 }
 0x1d0   : > { %v1080_v13 = vadd.f32 %v1965_v57, %v695_v62  ;;  %v780_v62 = vadd.f32 %v2888_v48, %v2841_v3 }
 0x1d1   : > { %v699_v16 = vpop.f32.mrf.mxu0  ;;  %v1974_v20 = vpop.f32.mrf.mxu1 }
 0x1d2   : > { %1259 = vst.msk [vmem:[%s2896_s27 + $0x118] sm:$0xff] %vm1223_vm0, %v1080_v13  ;;  %v700_v34 = vadd.f32 %v2888_v48, %v699_v16  ;;  %v795_v16 = vadd.f32 %v2888_v48, %v2853_v15 }
 0x1d3   : > { %v701_v21 = vpop.f32.mrf.mxu0  ;;  %v1104_v58 = vpop.f32.mrf.mxu1 }
 0x1d4   : > { %v1085_v24 = vadd.f32 %v1084_v50, %v700_v34  ;;  %v785_v50 = vadd.f32 %v2888_v48, %v2845_v7 }
 0x1d5   : > { %v704_v46 = vpop.f32.mrf.mxu0  ;;  %v3024_v25 = vpop.f32.mrf.mxu1 }
 0x1d6   : > { %1260 = vst.msk [vmem:[%s2896_s27 + $0x120] sm:$0xff] %vm1223_vm0, %v1085_v24  ;;  %v705_v28 = vadd.f32 %v2888_v48, %v704_v46 }
 0x1d7   : > { %v706_v6 = vpop.f32.mrf.mxu0  ;;  %v1114_v42 = vpop.f32.mrf.mxu1 }
 0x1d8   : > { %v1090_v32 = vadd.f32 %v1968_v4, %v705_v28  ;;  %v805_v6 = vadd.f32 %v2888_v48, %v2861_v23 }
 0x1d9   : > { %v709_v33 = vpop.f32.mrf.mxu0  ;;  %v3029_v2 = vpop.f32.mrf.mxu1 }
 0x1da   : > { %1261 = vst.msk [vmem:[%s2896_s27 + $0x128] sm:$0xff] %vm1223_vm0, %v1090_v32  ;;  %v710_v5 = vadd.f32 %v2888_v48, %v709_v33 }
 0x1db   : > { %v711_v36 = vpop.f32.mrf.mxu0  ;;  %v3034_v37 = vpop.f32.mrf.mxu1 }
 0x1dc   : > { %v1095_v40 = vadd.f32 %v1094_v38, %v710_v5  ;;  %v800_v5 = vadd.f32 %v2888_v48, %v2857_v19 }
 0x1dd   : > { %v714_v56 = vpop.f32.mrf.mxu0  ;;  %v3036_v14 = vpop.f32.mrf.mxu1 }
 0x1de   : > { %1262 = vst.msk [vmem:[%s2896_s27 + $0x130] sm:$0xff] %vm1223_vm0, %v1095_v40  ;;  %v715_v44 = vadd.f32 %v2888_v48, %v714_v56 }
 0x1df   : > { %v716_v45 = vpop.f32.mrf.mxu0  ;;  %v3041_v29 = vpop.f32.mrf.mxu1 }
 0x1e0   : > { %v1100_v49 = vadd.f32 %v1971_v54, %v715_v44 }
 0x1e1   : > { %v719_v52 = vpop.f32.mrf.mxu0  ;;  %v1986_v17 = vpop.f32.mrf.mxu1 }
 0x1e2   : > { %1263 = vst.msk [vmem:[%s2896_s27 + $0x138] sm:$0xff] %vm1223_vm0, %v1100_v49  ;;  %v720_v22 = vadd.f32 %v2888_v48, %v719_v52  ;;  %v1150_v60 = vadd.f32 %v1986_v17, %v765_v10  ;;  %v810_v49 = vadd.f32 %v2888_v48, %v2865_v27 }
 0x1e3   : > { %v721_v57 = vpop.f32.mrf.mxu0  ;;  %v1144_v61 = vpop.f32.mrf.mxu1 }
 0x1e4   : > { %v1105_v55 = vadd.f32 %v1104_v58, %v720_v22  ;;  %1273 = vst.msk [vmem:[%s2896_s27 + $0x188] sm:$0xff] %vm1223_vm0, %v1150_v60  ;;  %v1145_v0 = vadd.f32 %v1144_v61, %v760_v53  ;;  %v790_v58 = vadd.f32 %v2888_v48, %v2849_v11  ;;  %v820_v61 = vadd.f32 %v2888_v48, %v2873_v35 }
 0x1e5   : > { %v724_v41 = vpop.f32.mrf.mxu0  ;;  %v1989_v1 = vpop.f32.mrf.mxu1 }
 0x1e6   : > { %1264 = vst.msk [vmem:[%s2896_s27 + $0x140] sm:$0xff] %vm1223_vm0, %v1105_v55  ;;  %1272 = vst.msk [vmem:[%s2896_s27 + $0x180] sm:$0xff] %vm1223_vm0, %v1145_v0  ;;  %v725_v4 = vadd.f32 %v2888_v48, %v724_v41  ;;  %v1160_v30 = vadd.f32 %v1989_v1, %v775_v18  ;;  %v835_v0 = vadd.f32 %v2888_v48, %v2885_v47 }
 0x1e7   : > { %v726_v8 = vpop.f32.mrf.mxu0  ;;  %v1154_v63 = vpop.f32.mrf.mxu1 }
 0x1e8   : > { %v1110_v26 = vadd.f32 %v1974_v20, %v725_v4  ;;  %1275 = vst.msk [vmem:[%s2896_s27 + $0x198] sm:$0xff] %vm1223_vm0, %v1160_v30  ;;  %v1155_v9 = vadd.f32 %v1154_v63, %v770_v51  ;;  %v830_v4 = vadd.f32 %v2888_v48, %v2881_v43 }
 0x1e9   : > { %v729_v54 = vpop.f32.mrf.mxu0  ;;  %v1992_v59 = vpop.f32.mrf.mxu1 }
 0x1ea   : > { %1265 = vst.msk [vmem:[%s2896_s27 + $0x148] sm:$0xff] %vm1223_vm0, %v1110_v26  ;;  %1274 = vst.msk [vmem:[%s2896_s27 + $0x190] sm:$0xff] %vm1223_vm0, %v1155_v9  ;;  %v730_v12 = vadd.f32 %v2888_v48, %v729_v54  ;;  %v1170_v38 = vadd.f32 %v1992_v59, %v785_v50 }
 0x1eb   : > { %v731_v13 = vpop.f32.mrf.mxu0  ;;  %v1164_v7 = vpop.f32.mrf.mxu1 }
 0x1ec   : > { %v1115_v20 = vadd.f32 %v1114_v42, %v730_v12  ;;  %1277 = vst.msk [vmem:[%s2896_s27 + $0x1a8] sm:$0xff] %vm1223_vm0, %v1170_v38  ;;  %v1165_v34 = vadd.f32 %v1164_v7, %v780_v62 }
 0x1ed   : > { %v734_v21 = vpop.f32.mrf.mxu0  ;;  %v1995_v3 = vpop.f32.mrf.mxu1 }
 0x1ee   : > { %1266 = vst.msk [vmem:[%s2896_s27 + $0x150] sm:$0xff] %vm1223_vm0, %v1115_v20  ;;  %1276 = vst.msk [vmem:[%s2896_s27 + $0x1a0] sm:$0xff] %vm1223_vm0, %v1165_v34  ;;  %v735_v24 = vadd.f32 %v2888_v48, %v734_v21  ;;  %v1180_v46 = vadd.f32 %v1995_v3, %v795_v16 }
 0x1ef   : > { %v736_v28 = vpop.f32.mrf.mxu0  ;;  %v1174_v15 = vpop.f32.mrf.mxu1 }
 0x1f0   : > { %v1120_v42 = vadd.f32 %v3024_v25, %v735_v24  ;;  %1279 = vst.msk [vmem:[%s2896_s27 + $0x1b8] sm:$0xff] %vm1223_vm0, %v1180_v46  ;;  %v1175_v32 = vadd.f32 %v1174_v15, %v790_v58  ;;  %v815_v25 = vadd.f32 %v2888_v48, %v2869_v31 }
 0x1f1   : > { %v739_v33 = vpop.f32.mrf.mxu0  ;;  %v1998_v11 = vpop.f32.mrf.mxu1 }
 0x1f2   : > { %1267 = vst.msk [vmem:[%s2896_s27 + $0x158] sm:$0xff] %vm1223_vm0, %v1120_v42  ;;  %1278 = vst.msk [vmem:[%s2896_s27 + $0x1b0] sm:$0xff] %vm1223_vm0, %v1175_v32  ;;  %v740_v36 = vadd.f32 %v2888_v48, %v739_v33  ;;  %v1190_v40 = vadd.f32 %v1998_v11, %v805_v6 }
 0x1f3   : > { %v741_v23 = vpop.f32.mrf.mxu0  ;;  %v1184_v56 = vpop.f32.mrf.mxu1 }
 0x1f4   : > { %v1125_v44 = vadd.f32 %v3034_v37, %v740_v36  ;;  %1281 = vst.msk [vmem:[%s2896_s27 + $0x1c8] sm:$0xff] %vm1223_vm0, %v1190_v40  ;;  %v1185_v45 = vadd.f32 %v1184_v56, %v800_v5  ;;  %v825_v37 = vadd.f32 %v2888_v48, %v2877_v39 }
 0x1f5   : > { %v744_v10 = vpop.f32.mrf.mxu0  ;;  %v2001_v19 = vpop.f32.mrf.mxu1 }
 0x1f6   : > { %1268 = vst.msk [vmem:[%s2896_s27 + $0x160] sm:$0xff] %vm1223_vm0, %v1125_v44  ;;  %1280 = vst.msk [vmem:[%s2896_s27 + $0x1c0] sm:$0xff] %vm1223_vm0, %v1185_v45  ;;  %v745_v52 = vadd.f32 %v2888_v48, %v744_v10  ;;  %v1200_v17 = vadd.f32 %v2001_v19, %v815_v25 }
 0x1f7   : > { %v746_v31 = vpop.f32.mrf.mxu0  ;;  %v1194_v53 = vpop.f32.mrf.mxu1 }
 0x1f8   : > { %v1130_v22 = vadd.f32 %v3029_v2, %v745_v52  ;;  %1283 = vst.msk [vmem:[%s2896_s27 + $0x1d8] sm:$0xff] %vm1223_vm0, %v1200_v17  ;;  %v1195_v60 = vadd.f32 %v1194_v53, %v810_v49 }
 0x1f9   : > { %v749_v57 = vpop.f32.mrf.mxu0  ;;  %v2004_v27 = vpop.f32.mrf.mxu1 }
 0x1fa   : > { %1269 = vst.msk [vmem:[%s2896_s27 + $0x168] sm:$0xff] %vm1223_vm0, %v1130_v22  ;;  %1282 = vst.msk [vmem:[%s2896_s27 + $0x1d0] sm:$0xff] %vm1223_vm0, %v1195_v60  ;;  %v750_v18 = vadd.f32 %v2888_v48, %v749_v57  ;;  %v1210_v55 = vadd.f32 %v2004_v27, %v825_v37 }
 0x1fb   : > { %v751_v39 = vpop.f32.mrf.mxu0  ;;  %v1204_v2 = vpop.f32.mrf.mxu1 }
 0x1fc   : > { %v1135_v41 = vadd.f32 %v3041_v29, %v750_v18  ;;  %1285 = vst.msk [vmem:[%s2896_s27 + $0x1e8] sm:$0xff] %vm1223_vm0, %v1210_v55  ;;  %v1205_v35 = vadd.f32 %v1204_v2, %v820_v61 }
 0x1fd   : > { %v754_v1 = vpop.f32.mrf.mxu0  ;;  %v2007_v51 = vpop.f32.mrf.mxu1 }
 0x1fe   : > { %1270 = vst.msk [vmem:[%s2896_s27 + $0x170] sm:$0xff] %vm1223_vm0, %v1135_v41  ;;  %1284 = vst.msk [vmem:[%s2896_s27 + $0x1e0] sm:$0xff] %vm1223_vm0, %v1205_v35  ;;  %v755_v30 = vadd.f32 %v2888_v48, %v754_v1  ;;  %v1220_v8 = vadd.f32 %v2007_v51, %v835_v0  ;;  %1294 = sbr.rel (!%p2368_p8) target bundleno = 579 (0x243), region = 40 }
 0x1ff   : > { %v756_v47 = vpop.f32.mrf.mxu0  ;;  %v1214_v63 = vpop.f32.mrf.mxu1 }
 0x200   : > { %v1140_v29 = vadd.f32 %v3036_v14, %v755_v30  ;;  %1287 = vst.msk [vmem:[%s2896_s27 + $0x1f8] sm:$0xff] %vm1223_vm0, %v1220_v8  ;;  %v1215_v50 = vadd.f32 %v1214_v63, %v830_v4 }
 0x202   : > { %1271 = vst.msk [vmem:[%s2896_s27 + $0x178] sm:$0xff] %vm1223_vm0, %v1140_v29  ;;  %1286 = vst.msk [vmem:[%s2896_s27 + $0x1f0] sm:$0xff] %vm1223_vm0, %v1215_v50 }
 0x203   : > { %s3365_s5 = smov (!%p1297_p7, %s1296_s5), 64 }
 0x204   : > { %s1782_s30 = sshll.u32 %s3365_s5, 7 }
 0x205   : > { %p1785_p11 = scmp.eq.s32.totalorder %s1782_s30, 0 }
 0x206   : > { %s3151_s23 = sshrl.u32 (!%p1785_p11), %s3365_s5, 6 }
 0x207   : > { %1305 = sbr.rel (%p1785_p11) target bundleno = 579 (0x243), region = 44  ;;  %p1786_p8 = scmp.le.s32.totalorder (!%p1785_p11), %s3151_s23, 0 }
 0x20c   : > { %1720 = sbr.rel (%p1786_p8) target bundleno = 562 (0x232), region = 126  ;;  %s3353_s2 = smov (!%p1786_p8), %s3145_s28 }
 0x20d   : > { %s3354_s6 = smov (!%p1786_p8), %s2896_s27  ;;  %s3160_s22 = smov (!%p1786_p8), 0  }
 0x20e   : > { %s3162_s9 = smov (!%p1786_p8), 0  }
 0x211 LB: >> { %v1494_v43 = vld [vmem:[%s2275_s6] sm:$0xff]  ;;  %v1496_v48 = vld [vmem:[%s2275_s6 + $0x8] sm:$0xff]  ;;  %v1498_v14 = vld [vmem:[%s2275_s6 + $0x10] sm:$0xff]  ;;  %s1622_s10 = sadd.s32 1, %s2279_s22  ;;  %s1488_s9 = sadd.s32 1, %s2283_s9   ;;  %s2283_s9 = sphi %s3162_s9, %s1488_s9   ;;  %s2279_s22 = sphi %s3160_s22, %s3357_s22   ;;  %s2275_s6 = sphi %s3354_s6, %s3356_s6   ;;  %s2271_s2 = sphi %s3353_s2, %s3355_s2  }
 0x212   : >> { %1495 = vst [vmem:[%s2271_s2] sm:$0xff] %v1494_v43  ;;  %1497 = vst [vmem:[%s2271_s2 + $0x8] sm:$0xff] %v1496_v48  ;;  %v1500_v26 = vld [vmem:[%s2275_s6 + $0x18] sm:$0xff]  ;;  %v1502_v9 = vld [vmem:[%s2275_s6 + $0x20] sm:$0xff]  ;;  %p1623_p4 = scmp.ge.s32.totalorder %s1622_s10, %s3151_s23  ;;  %p1487_p5 = scmp.ge.s32.totalorder %s1488_s9, %s3151_s23 }
 0x213   : >> { %1499 = vst [vmem:[%s2271_s2 + $0x10] sm:$0xff] %v1498_v14  ;;  %v1504_v54 = vld [vmem:[%s2275_s6 + $0x28] sm:$0xff]  ;;  %1501 = vst [vmem:[%s2271_s2 + $0x18] sm:$0xff] %v1500_v26  ;;  %v1506_v59 = vld [vmem:[%s2275_s6 + $0x30] sm:$0xff] }
 0x214   : >> { %1503 = vst [vmem:[%s2271_s2 + $0x20] sm:$0xff] %v1502_v9  ;;  %1505 = vst [vmem:[%s2271_s2 + $0x28] sm:$0xff] %v1504_v54  ;;  %v1508_v62 = vld [vmem:[%s2275_s6 + $0x38] sm:$0xff]  ;;  %v1510_v12 = vld [vmem:[%s2275_s6 + $0x40] sm:$0xff]  ;;  %s3367_s10 = smov (%p1623_p4, %s1622_s10), 0 }
 0x215   : >> { %1507 = vst [vmem:[%s2271_s2 + $0x30] sm:$0xff] %v1506_v59  ;;  %1509 = vst [vmem:[%s2271_s2 + $0x38] sm:$0xff] %v1508_v62  ;;  %v1512_v38 = vld [vmem:[%s2275_s6 + $0x48] sm:$0xff]  ;;  %v1514_v13 = vld [vmem:[%s2275_s6 + $0x50] sm:$0xff]  ;;  %s1787_s11 = sshll.u32 %s3367_s10, 9  ;;  %s3357_s22 = smov %s3367_s10 }
 0x216   : >> { %1511 = vst [vmem:[%s2271_s2 + $0x40] sm:$0xff] %v1510_v12  ;;  %v1516_v7 = vld [vmem:[%s2275_s6 + $0x58] sm:$0xff]  ;;  %1513 = vst [vmem:[%s2271_s2 + $0x48] sm:$0xff] %v1512_v38  ;;  %v1518_v16 = vld [vmem:[%s2275_s6 + $0x60] sm:$0xff]  ;;  %s3218_s12 = scalar_lea.vmem %s2896_s27, %s1787_s11 [#allocation5]   ;;  %s3221_s13 = scalar_lea.vmem %s3145_s28, %s1787_s11  }
 0x217   : >> { %1515 = vst [vmem:[%s2271_s2 + $0x50] sm:$0xff] %v1514_v13  ;;  %1517 = vst [vmem:[%s2271_s2 + $0x58] sm:$0xff] %v1516_v7  ;;  %v1520_v20 = vld [vmem:[%s2275_s6 + $0x68] sm:$0xff]  ;;  %v1522_v34 = vld [vmem:[%s2275_s6 + $0x70] sm:$0xff] }
 0x218   : >> { %1519 = vst [vmem:[%s2271_s2 + $0x60] sm:$0xff] %v1518_v16  ;;  %1521 = vst [vmem:[%s2271_s2 + $0x68] sm:$0xff] %v1520_v20  ;;  %v1524_v21 = vld [vmem:[%s2275_s6 + $0x78] sm:$0xff]  ;;  %v1526_v3 = vld [vmem:[%s2275_s6 + $0x80] sm:$0xff] }
 0x219   : >> { %1523 = vst [vmem:[%s2271_s2 + $0x70] sm:$0xff] %v1522_v34  ;;  %v1528_v58 = vld [vmem:[%s2275_s6 + $0x88] sm:$0xff]  ;;  %1525 = vst [vmem:[%s2271_s2 + $0x78] sm:$0xff] %v1524_v21  ;;  %v1530_v24 = vld [vmem:[%s2275_s6 + $0x90] sm:$0xff] }
 0x21a   : >> { %1527 = vst [vmem:[%s2271_s2 + $0x80] sm:$0xff] %v1526_v3  ;;  %1529 = vst [vmem:[%s2271_s2 + $0x88] sm:$0xff] %v1528_v58  ;;  %v1532_v46 = vld [vmem:[%s2275_s6 + $0x98] sm:$0xff]  ;;  %v1534_v28 = vld [vmem:[%s2275_s6 + $0xa0] sm:$0xff] }
 0x21b   : >> { %1531 = vst [vmem:[%s2271_s2 + $0x90] sm:$0xff] %v1530_v24  ;;  %1533 = vst [vmem:[%s2271_s2 + $0x98] sm:$0xff] %v1532_v46  ;;  %v1536_v15 = vld [vmem:[%s2275_s6 + $0xa8] sm:$0xff]  ;;  %v1538_v6 = vld [vmem:[%s2275_s6 + $0xb0] sm:$0xff] }
 0x21c   : >> { %1535 = vst [vmem:[%s2271_s2 + $0xa0] sm:$0xff] %v1534_v28  ;;  %v1540_v42 = vld [vmem:[%s2275_s6 + $0xb8] sm:$0xff]  ;;  %1537 = vst [vmem:[%s2271_s2 + $0xa8] sm:$0xff] %v1536_v15  ;;  %v1542_v32 = vld [vmem:[%s2275_s6 + $0xc0] sm:$0xff] }
 0x21d   : >> { %1539 = vst [vmem:[%s2271_s2 + $0xb0] sm:$0xff] %v1538_v6  ;;  %1541 = vst [vmem:[%s2271_s2 + $0xb8] sm:$0xff] %v1540_v42  ;;  %v1544_v33 = vld [vmem:[%s2275_s6 + $0xc8] sm:$0xff]  ;;  %v1546_v11 = vld [vmem:[%s2275_s6 + $0xd0] sm:$0xff] }
 0x21e   : >> { %1543 = vst [vmem:[%s2271_s2 + $0xc0] sm:$0xff] %v1542_v32  ;;  %1545 = vst [vmem:[%s2271_s2 + $0xc8] sm:$0xff] %v1544_v33  ;;  %v1548_v5 = vld [vmem:[%s2275_s6 + $0xd8] sm:$0xff]  ;;  %v1550_v36 = vld [vmem:[%s2275_s6 + $0xe0] sm:$0xff] }
 0x21f   : >> { %1547 = vst [vmem:[%s2271_s2 + $0xd0] sm:$0xff] %v1546_v11  ;;  %v1552_v40 = vld [vmem:[%s2275_s6 + $0xe8] sm:$0xff]  ;;  %1549 = vst [vmem:[%s2271_s2 + $0xd8] sm:$0xff] %v1548_v5  ;;  %v1554_v23 = vld [vmem:[%s2275_s6 + $0xf0] sm:$0xff] }
 0x220   : >> { %1551 = vst [vmem:[%s2271_s2 + $0xe0] sm:$0xff] %v1550_v36  ;;  %1553 = vst [vmem:[%s2271_s2 + $0xe8] sm:$0xff] %v1552_v40  ;;  %v1556_v56 = vld [vmem:[%s2275_s6 + $0xf8] sm:$0xff]  ;;  %v1558_v25 = vld [vmem:[%s2275_s6 + $0x100] sm:$0xff] }
 0x221   : >> { %1555 = vst [vmem:[%s2271_s2 + $0xf0] sm:$0xff] %v1554_v23  ;;  %1557 = vst [vmem:[%s2271_s2 + $0xf8] sm:$0xff] %v1556_v56  ;;  %v1560_v44 = vld [vmem:[%s2275_s6 + $0x108] sm:$0xff]  ;;  %v1562_v45 = vld [vmem:[%s2275_s6 + $0x110] sm:$0xff] }
 0x222   : >> { %1559 = vst [vmem:[%s2271_s2 + $0x100] sm:$0xff] %v1558_v25  ;;  %v1564_v10 = vld [vmem:[%s2275_s6 + $0x118] sm:$0xff]  ;;  %1561 = vst [vmem:[%s2271_s2 + $0x108] sm:$0xff] %v1560_v44  ;;  %v1566_v19 = vld [vmem:[%s2275_s6 + $0x120] sm:$0xff] }
 0x223   : >> { %1563 = vst [vmem:[%s2271_s2 + $0x110] sm:$0xff] %v1562_v45  ;;  %1565 = vst [vmem:[%s2271_s2 + $0x118] sm:$0xff] %v1564_v10  ;;  %v1568_v49 = vld [vmem:[%s2275_s6 + $0x128] sm:$0xff]  ;;  %v1570_v52 = vld [vmem:[%s2275_s6 + $0x130] sm:$0xff] }
 0x224   : >> { %1567 = vst [vmem:[%s2271_s2 + $0x120] sm:$0xff] %v1566_v19  ;;  %1569 = vst [vmem:[%s2271_s2 + $0x128] sm:$0xff] %v1568_v49  ;;  %v1572_v17 = vld [vmem:[%s2275_s6 + $0x138] sm:$0xff]  ;;  %v1574_v31 = vld [vmem:[%s2275_s6 + $0x140] sm:$0xff] }
 0x225   : >> { %1571 = vst [vmem:[%s2271_s2 + $0x130] sm:$0xff] %v1570_v52  ;;  %v1576_v53 = vld [vmem:[%s2275_s6 + $0x148] sm:$0xff]  ;;  %1573 = vst [vmem:[%s2271_s2 + $0x138] sm:$0xff] %v1572_v17  ;;  %v1578_v37 = vld [vmem:[%s2275_s6 + $0x150] sm:$0xff] }
 0x226   : >> { %1575 = vst [vmem:[%s2271_s2 + $0x140] sm:$0xff] %v1574_v31  ;;  %1577 = vst [vmem:[%s2271_s2 + $0x148] sm:$0xff] %v1576_v53  ;;  %v1580_v22 = vld [vmem:[%s2275_s6 + $0x158] sm:$0xff]  ;;  %v1582_v60 = vld [vmem:[%s2275_s6 + $0x160] sm:$0xff] }
 0x227   : >> { %1579 = vst [vmem:[%s2271_s2 + $0x150] sm:$0xff] %v1578_v37  ;;  %1581 = vst [vmem:[%s2271_s2 + $0x158] sm:$0xff] %v1580_v22  ;;  %v1584_v57 = vld [vmem:[%s2275_s6 + $0x168] sm:$0xff]  ;;  %v1586_v27 = vld [vmem:[%s2275_s6 + $0x170] sm:$0xff] }
 0x228   : >> { %1583 = vst [vmem:[%s2271_s2 + $0x160] sm:$0xff] %v1582_v60  ;;  %v1588_v61 = vld [vmem:[%s2275_s6 + $0x178] sm:$0xff]  ;;  %1585 = vst [vmem:[%s2271_s2 + $0x168] sm:$0xff] %v1584_v57  ;;  %v1590_v18 = vld [vmem:[%s2275_s6 + $0x180] sm:$0xff] }
 0x229   : >> { %1587 = vst [vmem:[%s2271_s2 + $0x170] sm:$0xff] %v1586_v27  ;;  %1589 = vst [vmem:[%s2271_s2 + $0x178] sm:$0xff] %v1588_v61  ;;  %v1592_v55 = vld [vmem:[%s2275_s6 + $0x188] sm:$0xff]  ;;  %v1594_v39 = vld [vmem:[%s2275_s6 + $0x190] sm:$0xff] }
 0x22a   : >> { %1591 = vst [vmem:[%s2271_s2 + $0x180] sm:$0xff] %v1590_v18  ;;  %1593 = vst [vmem:[%s2271_s2 + $0x188] sm:$0xff] %v1592_v55  ;;  %v1596_v2 = vld [vmem:[%s2275_s6 + $0x198] sm:$0xff]  ;;  %v1598_v0 = vld [vmem:[%s2275_s6 + $0x1a0] sm:$0xff] }
 0x22b   : >> { %1595 = vst [vmem:[%s2271_s2 + $0x190] sm:$0xff] %v1594_v39  ;;  %v1600_v41 = vld [vmem:[%s2275_s6 + $0x1a8] sm:$0xff]  ;;  %1597 = vst [vmem:[%s2271_s2 + $0x198] sm:$0xff] %v1596_v2  ;;  %v1602_v35 = vld [vmem:[%s2275_s6 + $0x1b0] sm:$0xff] }
 0x22c   : >> { %1599 = vst [vmem:[%s2271_s2 + $0x1a0] sm:$0xff] %v1598_v0  ;;  %1601 = vst [vmem:[%s2271_s2 + $0x1a8] sm:$0xff] %v1600_v41  ;;  %v1604_v1 = vld [vmem:[%s2275_s6 + $0x1b8] sm:$0xff]  ;;  %v1606_v51 = vld [vmem:[%s2275_s6 + $0x1c0] sm:$0xff] }
 0x22d   : >> { %1603 = vst [vmem:[%s2271_s2 + $0x1b0] sm:$0xff] %v1602_v35  ;;  %1605 = vst [vmem:[%s2271_s2 + $0x1b8] sm:$0xff] %v1604_v1  ;;  %v1608_v4 = vld [vmem:[%s2275_s6 + $0x1c8] sm:$0xff]  ;;  %v1610_v30 = vld [vmem:[%s2275_s6 + $0x1d0] sm:$0xff]  ;;  %1490 = sbr.rel (!%p1487_p5) target bundleno = 529 (0x211), region = 132 }
 0x22e   : >> { %1607 = vst [vmem:[%s2271_s2 + $0x1c0] sm:$0xff] %v1606_v51  ;;  %v1612_v8 = vld [vmem:[%s2275_s6 + $0x1d8] sm:$0xff]  ;;  %1609 = vst [vmem:[%s2271_s2 + $0x1c8] sm:$0xff] %v1608_v4  ;;  %v1614_v47 = vld [vmem:[%s2275_s6 + $0x1e0] sm:$0xff] }
 0x22f   : >> { %1611 = vst [vmem:[%s2271_s2 + $0x1d0] sm:$0xff] %v1610_v30  ;;  %1613 = vst [vmem:[%s2271_s2 + $0x1d8] sm:$0xff] %v1612_v8  ;;  %v1616_v63 = vld [vmem:[%s2275_s6 + $0x1e8] sm:$0xff]  ;;  %v1618_v29 = vld [vmem:[%s2275_s6 + $0x1f0] sm:$0xff] }
 0x230   : >> { %1615 = vst [vmem:[%s2271_s2 + $0x1e0] sm:$0xff] %v1614_v47  ;;  %1617 = vst [vmem:[%s2271_s2 + $0x1e8] sm:$0xff] %v1616_v63  ;;  %v1620_v50 = vld [vmem:[%s2275_s6 + $0x1f8] sm:$0xff]  ;;  %s3356_s6 = smov %s3218_s12 }
 0x231   : >> { %1619 = vst [vmem:[%s2271_s2 + $0x1f0] sm:$0xff] %v1618_v29  ;;  %1621 = vst [vmem:[%s2271_s2 + $0x1f8] sm:$0xff] %v1620_v50  ;;  %s3355_s2 = smov %s3221_s13 }
 0x232 PF: > { %s3326_s14 = sand.u32 63, %s3365_s5   ;;  %s1798_s19 = sshll.u32 %s3151_s23, 9 }
 0x233   : > { %s1633_s20 = scalar_lea.vmem %s2896_s27, %s1798_s19 [#allocation5]   ;;  %s1635_s24 = scalar_lea.vmem %s3145_s28, %s1798_s19  }
 0x234   : > { %p1792_p6 = scmp.le.s32.totalorder %s3326_s14, 0 }
 0x235   : > { %s2285_s25 = smov (!%p1792_p6), %s1635_s24   ;;  %s2289_s26 = smov (!%p1792_p6), %s1633_s20  }
 0x236   : > { %1734 = sbr.rel (%p1792_p6) target bundleno = 579 (0x243), region = 137  ;;  %s2293_s8 = smov (!%p1792_p6), 0  }
 0x237   : > { %s2297_s4 = smov (!%p1792_p6), 0  }
 0x23b LB: >> { %v1645_v43 = vld [vmem:[%s2291_s26] sm:$0xff]  ;;  %s1647_s29 = sadd.s32 1, %s2295_s8  ;;  %s1639_s4 = sadd.s32 1, %s2299_s4   ;;  %s2299_s4 = sphi %s2297_s4, %s1639_s4   ;;  %s2295_s8 = sphi %s2293_s8, %s2294_s8   ;;  %s2291_s26 = sphi %s2289_s26, %s1652_s26   ;;  %s2287_s25 = sphi %s2285_s25, %s1653_s25  }
 0x23c   : >> { %1646 = vst [vmem:[%s2287_s25] sm:$0xff] %v1645_v43  ;;  %p1648_p9 = scmp.ge.s32.totalorder %s1647_s29, %s3326_s14  ;;  %p1638_p10 = scmp.ge.s32.totalorder %s1639_s4, %s3326_s14 }
 0x23e   : >> { %s3369_s29 = smov (%p1648_p9, %s1647_s29), 0  ;;  %1641 = sbr.rel (!%p1638_p10) target bundleno = 571 (0x23b), region = 143 }
 0x23f   : >> { %s1793_s27 = sshll.u32 %s3369_s29, 3  ;;  %s2294_s8 = smov %s3369_s29  }
 0x240   : >> { %s1652_s26 = scalar_lea.vmem %s1633_s20, %s1793_s27 [#allocation5]   ;;  %s1653_s25 = scalar_lea.vmem %s1635_s24, %s1793_s27  }
 0x243 PF: > { %p15_p12 = scmp.ge.s32.totalorder %s2350_s18, 4   ;;  %s3358_s14 = smov %s2259_s15 }
 0x244   : > { %s3359_s15 = smov %s2263_s16  ;;  %s3360_s16 = smov %s2360_s21 }
 0x245   : > { %s3361_s17 = smov %s2350_s18  ;;  %17 = sbr.rel (!%p15_p12) target bundleno = 6 (0x6), region = 154 }
 0x24a   :  { %1669 = vsyncpa [#allocation4], 1 }
 0x24b   :  { %1671 = vsyncpa [#allocation4 + $0x1], 1 }

</bundles_post_ra>
